<compile_context>
chip_gen: v7x
topology: tpu7x:2x2x1
jax: 0.10.0
libtpu: 0.0.40
codegen_flags: <defaults>
</compile_context>

<pallas_src>
import functools

import jax
import jax.numpy as jnp
from jax.experimental import pallas as pl
from jax.experimental.pallas import tpu as pltpu


def encoder_layer_kernel(xq_ref, xkv_ref,
                         wq_ref, bq_ref, wkv_ref, bkv_ref,
                         wo_ref, bo_ref, w1_ref, b1_ref, w2_ref, b2_ref,
                         g1_ref, be1_ref, g2_ref, be2_ref,
                         o_ref,
                         q_sc, m_sc, l_sc, acc_sc,
                         *, tq, tk, d, h, eps):
    hd = d // h
    f32 = jnp.float32
    bf16 = jnp.bfloat16
    ki = pl.program_id(2)
    nk = pl.num_programs(2)

    # ---- first key tile: project Q for this query tile, reset softmax stats ----
    @pl.when(ki == 0)
    def _init():
        xq = xq_ref[...]                                             # (tq, d) f32
        # scale (8/head_dim, per the module) already folded into wq/bq.
        q = jnp.dot(xq.astype(bf16), wq_ref[...],
                    preferred_element_type=f32) + bq_ref[...]        # (tq, d)
        q_sc[...] = q.reshape(tq, h, hd).transpose(1, 0, 2).astype(bf16)
        m_sc[...] = jnp.full(m_sc.shape, -jnp.inf, m_sc.dtype)
        l_sc[...] = jnp.zeros(l_sc.shape, l_sc.dtype)
        acc_sc[...] = jnp.zeros(acc_sc.shape, acc_sc.dtype)

    # ---- K/V projection for this key tile (bf16 MXU, f32 accumulation) ----
    xkv = xkv_ref[...]                                               # (tk, d) f32
    kv = jnp.dot(xkv.astype(bf16), wkv_ref[...],
                 preferred_element_type=f32) + bkv_ref[...]          # (tk, 2d)
    # TODO(synk): head relayouts go through XLU/VMEM-copy; could land directly
    #             in (h, tk, hd) by pre-reshaping wkv in the wrapper.
    k = kv[:, :d].reshape(tk, h, hd).transpose(1, 0, 2).astype(bf16)   # (h, tk, hd)
    v = kv[:, d:].reshape(tk, h, hd).transpose(1, 0, 2).astype(bf16)   # (h, tk, hd)

    # ---- online-softmax update (flash pattern) ----
    s = jnp.einsum('hqe,hke->hqk', q_sc[...], k,
                   preferred_element_type=f32)                       # (h, tq, tk)
    m_prev = m_sc[...]
    m_new = jnp.maximum(m_prev, jnp.max(s, axis=-1, keepdims=True))
    alpha = jnp.exp(m_prev - m_new)
    p = jnp.exp(s - m_new)
    l_sc[...] = alpha * l_sc[...] + jnp.sum(p, axis=-1, keepdims=True)
    acc_sc[...] = alpha * acc_sc[...] + jnp.einsum(
        'hqk,hke->hqe', p.astype(bf16), v, preferred_element_type=f32)
    m_sc[...] = m_new

    # ---- last key tile: out_proj + residual + LN1 + FFN + residual + LN2 ----
    @pl.when(ki == nk - 1)
    def _finalize():
        inv_l = pl.reciprocal(l_sc[...], approx=True)                # EUP slot
        ctx = (acc_sc[...] * inv_l).transpose(1, 0, 2).reshape(tq, d)
        attn = jnp.dot(ctx.astype(bf16), wo_ref[...],
                       preferred_element_type=f32) + bo_ref[...]

        def layernorm(t, g, be):
            # fused one-pass reduction: var = E[x^2] - mu^2
            mu = jnp.mean(t, axis=-1, keepdims=True)
            msq = jnp.mean(t * t, axis=-1, keepdims=True)
            var = jnp.maximum(msq - mu * mu, 0.0)
            return (t - mu) * jax.lax.rsqrt(var + eps) * g + be

        xq = xq_ref[...]
        x1 = layernorm(xq + attn, g1_ref[...], be1_ref[...])

        hmid = jnp.maximum(
            jnp.dot(x1.astype(bf16), w1_ref[...],
                    preferred_element_type=f32) + b1_ref[...], 0.0)  # (tq, dff)
        ff = jnp.dot(hmid.astype(bf16), w2_ref[...],
                     preferred_element_type=f32) + b2_ref[...]

        o_ref[...] = layernorm(x1 + ff, g2_ref[...], be2_ref[...])


def _pick_tile(n, target):
    """Largest divisor of n that is <= target and (== n or a multiple of 8)."""
    if n <= target:
        return n
    for t in range(min(target, n), 0, -1):
        if n % t == 0 and (t == n or t % 8 == 0):
            return t
    return n


def _vmem_limit_bytes():
    # ~75% of physical VMEM, capped at 100 MiB (v5e/v6e: 128 MiB physical;
    # v7x: 64 MiB -> 48 MiB).  Conservative 48 MiB fallback if query fails.
    try:
        cap = int(pltpu.get_tpu_info().vmem_capacity_bytes)
    except Exception:
        cap = 64 * 1024 * 1024
    return int(min(cap * 3 // 4, 100 * 1024 * 1024))


def transformer_encoder_layer(x, params, *, nhead, eps=1e-5,
                              tq_target=256, tk_target=512):
    """x: (seq_len n, batch b, d_model d); params as produced by init_params."""
    n, b, d = x.shape
    dff = params['w1'].shape[1]
    h = nhead
    hd = d // h
    bf16 = jnp.bfloat16

    tq = _pick_tile(n, tq_target)
    tk = _pick_tile(n, tk_target)
    nq = n // tq
    nk = n // tk

    # Batch-major so each grid step DMAs contiguous (tile, d) slabs.
    xb = jnp.transpose(x, (1, 0, 2))                                 # (b, n, d)

    # Fold the module's query scale (8.0 / head_dim, from dot_product_attention)
    # into the q columns of the in_proj weight and bias.  (Kept as 8/hd — not
    # hd**-0.5 — to match the original module's semantics exactly.)
    scale = 8.0 / hd
    wqkv, bqkv = params['wqkv'], params['bqkv']
    wq = (wqkv[:, :d] * scale).astype(bf16)
    bq = bqkv[:, :d] * scale
    wkv = wqkv[:, d:].astype(bf16)
    bkv = bqkv[:, d:]

    args = (xb, xb,
            wq, bq, wkv, bkv,
            params['wo'].astype(bf16), params['bo'],
            params['w1'].astype(bf16), params['b1'],
            params['w2'].astype(bf16), params['b2'],
            params['g1'], params['be1'], params['g2'], params['be2'])

    kernel = functools.partial(encoder_layer_kernel,
                               tq=tq, tk=tk, d=d, h=h, eps=eps)

    # Invariant weights: whole-array, single-buffered VMEM residents.
    def wspec():
        return pl.BlockSpec(memory_space=pltpu.MemorySpace.VMEM)

    in_specs = [
        pl.BlockSpec((None, tq, d), lambda bi, qi, ki: (bi, qi, 0)),  # x: query rows
        pl.BlockSpec((None, tk, d), lambda bi, qi, ki: (bi, ki, 0)),  # x: key rows
    ] + [wspec() for _ in range(14)]

    out = pl.pallas_call(
        kernel,
        grid=(b, nq, nk),
        out_shape=jax.ShapeDtypeStruct((b, n, d), jnp.float32),
        in_specs=in_specs,
        out_specs=pl.BlockSpec((None, tq, d), lambda bi, qi, ki: (bi, qi, 0)),
        scratch_shapes=[
            pltpu.VMEM((h, tq, hd), jnp.bfloat16),   # cached Q (per q tile)
            pltpu.VMEM((h, tq, 1), jnp.float32),     # running max m
            pltpu.VMEM((h, tq, 1), jnp.float32),     # running denom l
            pltpu.VMEM((h, tq, hd), jnp.float32),    # running context acc
        ],
        compiler_params=pltpu.CompilerParams(
            dimension_semantics=("parallel", "parallel", "arbitrary"),
            vmem_limit_bytes=_vmem_limit_bytes()),
    )(*args)
    return jnp.transpose(out, (1, 0, 2))                             # (n, b, d)


def init_params(key, d_model, nhead, dim_feedforward):
    """Deterministic init mirroring the module (xavier for attn, uniform for FF)."""
    ks = jax.random.split(key, 6)

    def xavier(k, fan_in, fan_out):
        bound = (6.0 / (fan_in + fan_out)) ** 0.5
        return jax.random.uniform(k, (fan_in, fan_out), jnp.float32, -bound, bound)

    def kaiming_like(k, fan_in, fan_out):
        bound = 1.0 / (fan_in ** 0.5)
        return jax.random.uniform(k, (fan_in, fan_out), jnp.float32, -bound, bound)

    d, dff = d_model, dim_feedforward
    return dict(
        wqkv=xavier(ks[0], d, 3 * d), bqkv=jnp.zeros((1, 3 * d), jnp.float32),
        wo=xavier(ks[1], d, d),       bo=jnp.zeros((1, d), jnp.float32),
        w1=kaiming_like(ks[2], d, dff),
        b1=jax.random.uniform(ks[3], (1, dff), jnp.float32, -1.0 / d ** 0.5, 1.0 / d ** 0.5),
        w2=kaiming_like(ks[4], dff, d),
        b2=jax.random.uniform(ks[5], (1, d), jnp.float32, -1.0 / dff ** 0.5, 1.0 / dff ** 0.5),
        g1=jnp.ones((1, d), jnp.float32), be1=jnp.zeros((1, d), jnp.float32),
        g2=jnp.ones((1, d), jnp.float32), be2=jnp.zeros((1, d), jnp.float32),
    )


def reference(x, p, nhead, eps=1e-5):
    """Pure-JAX f32 mirror of the PyTorch forward (mask=None)."""
    n, b, d = x.shape
    hd = d // nhead
    xf = x.reshape(n * b, d)
    qkv = xf @ p['wqkv'] + p['bqkv']
    q, k, v = qkv[:, :d], qkv[:, d:2 * d], qkv[:, 2 * d:]

    def heads(t):
        return t.reshape(n, b * nhead, hd).transpose(1, 0, 2)        # (b*h, n, hd)

    q = heads(q) * (8.0 / hd)                                        # module's scale
    k = heads(k)
    v = heads(v)
    attn = jax.nn.softmax(jnp.einsum('bqe,bke->bqk', q, k), axis=-1)
    out = jnp.einsum('bqk,bke->bqe', attn, v)
    out = out.transpose(1, 0, 2).reshape(n * b, d)
    ao = out @ p['wo'] + p['bo']

    def ln(t, g, be):
        mu = t.mean(-1, keepdims=True)
        var = ((t - mu) ** 2).mean(-1, keepdims=True)
        return (t - mu) / jnp.sqrt(var + eps) * g + be

    x1 = ln(xf + ao, p['g1'], p['be1'])
    ff = jnp.maximum(x1 @ p['w1'] + p['b1'], 0.0) @ p['w2'] + p['b2']
    x2 = ln(x1 + ff, p['g2'], p['be2'])
    return x2.reshape(n, b, d)


if __name__ == "__main__":
    key = jax.random.PRNGKey(0)

    # Case 1: small shapes consistent with the module: seq=8, batch=2,
    # d_model=32, nhead=4 (head_dim=8), dim_feedforward=64 (single-tile grid).
    n, b, d_model, nhead, dff = 8, 2, 32, 4, 64
    kx, kp = jax.random.split(key)
    x = jax.random.normal(kx, (n, b, d_model), jnp.float32)
    params = init_params(kp, d_model, nhead, dff)
    out = jax.block_until_ready(transformer_encoder_layer(x, params, nhead=nhead))
    ref = jax.block_until_ready(reference(x, params, nhead))
    assert out.shape == (n, b, d_model)
    max_err = float(jnp.max(jnp.abs(out - ref)))
    assert max_err < 5e-2, f"case1 mismatch vs reference: {max_err}"

    # Case 2: force a multi-tile (2 query tiles x 2 key tiles) grid to exercise
    # the online-softmax accumulation and pl.when init/finalize paths.
    n2 = 16
    kx2, kp2 = jax.random.split(kp)
    x2 = jax.random.normal(kx2, (n2, b, d_model), jnp.float32)
    params2 = init_params(kp2, d_model, nhead, dff)
    out2 = jax.block_until_ready(
        transformer_encoder_layer(x2, params2, nhead=nhead,
                                  tq_target=8, tk_target=8))
    ref2 = jax.block_until_ready(reference(x2, params2, nhead))
    max_err2 = float(jnp.max(jnp.abs(out2 - ref2)))
    assert max_err2 < 5e-2, f"case2 mismatch vs reference: {max_err2}"

    print("KERNEL_OK")
</pallas_src>

<mosaic_0001>
module attributes {stable_mosaic.version = 11 : i64} {
  func.func @encoder_layer_kernel(%arg0: i32, %arg1: i32, %arg2: i32, %arg3: memref<1x8x32xf32, #tpu.memory_space<vmem>>, %arg4: memref<1x8x32xf32, #tpu.memory_space<vmem>>, %arg5: memref<32x32xbf16, #tpu.memory_space<vmem>>, %arg6: memref<1x32xf32, #tpu.memory_space<vmem>>, %arg7: memref<32x64xbf16, #tpu.memory_space<vmem>>, %arg8: memref<1x64xf32, #tpu.memory_space<vmem>>, %arg9: memref<32x32xbf16, #tpu.memory_space<vmem>>, %arg10: memref<1x32xf32, #tpu.memory_space<vmem>>, %arg11: memref<32x64xbf16, #tpu.memory_space<vmem>>, %arg12: memref<1x64xf32, #tpu.memory_space<vmem>>, %arg13: memref<64x32xbf16, #tpu.memory_space<vmem>>, %arg14: memref<1x32xf32, #tpu.memory_space<vmem>>, %arg15: memref<1x32xf32, #tpu.memory_space<vmem>>, %arg16: memref<1x32xf32, #tpu.memory_space<vmem>>, %arg17: memref<1x32xf32, #tpu.memory_space<vmem>>, %arg18: memref<1x32xf32, #tpu.memory_space<vmem>>, %arg19: memref<1x8x32xf32, #tpu.memory_space<vmem>>, %arg20: memref<4x8x8xbf16, #tpu.memory_space<vmem>>, %arg21: memref<4x8x1xf32, #tpu.memory_space<vmem>>, %arg22: memref<4x8x1xf32, #tpu.memory_space<vmem>>, %arg23: memref<4x8x8xf32, #tpu.memory_space<vmem>>) attributes {dimension_semantics = [#tpu.dimension_semantics<parallel>, #tpu.dimension_semantics<parallel>, #tpu.dimension_semantics<arbitrary>], iteration_bounds = array<i64: 2, 1, 1>, scalar_prefetch = 0 : i64, scratch_operands = 4 : i64, tpu.core_type = #tpu.core_type<tc>, window_params = [{transform_indices = @transform_0, window_bounds = array<i64: 1, 8, 32>}, {transform_indices = @transform_1, window_bounds = array<i64: 1, 8, 32>}, {pipeline_mode = #tpu.pipeline_mode<synchronous>, transform_indices = @transform_2, window_bounds = array<i64: 32, 32>}, {pipeline_mode = #tpu.pipeline_mode<synchronous>, transform_indices = @transform_3, window_bounds = array<i64: 1, 32>}, {pipeline_mode = #tpu.pipeline_mode<synchronous>, transform_indices = @transform_4, window_bounds = array<i64: 32, 64>}, {pipeline_mode = #tpu.pipeline_mode<synchronous>, transform_indices = @transform_5, window_bounds = array<i64: 1, 64>}, {pipeline_mode = #tpu.pipeline_mode<synchronous>, transform_indices = @transform_6, window_bounds = array<i64: 32, 32>}, {pipeline_mode = #tpu.pipeline_mode<synchronous>, transform_indices = @transform_7, window_bounds = array<i64: 1, 32>}, {pipeline_mode = #tpu.pipeline_mode<synchronous>, transform_indices = @transform_8, window_bounds = array<i64: 32, 64>}, {pipeline_mode = #tpu.pipeline_mode<synchronous>, transform_indices = @transform_9, window_bounds = array<i64: 1, 64>}, {pipeline_mode = #tpu.pipeline_mode<synchronous>, transform_indices = @transform_10, window_bounds = array<i64: 64, 32>}, {pipeline_mode = #tpu.pipeline_mode<synchronous>, transform_indices = @transform_11, window_bounds = array<i64: 1, 32>}, {pipeline_mode = #tpu.pipeline_mode<synchronous>, transform_indices = @transform_12, window_bounds = array<i64: 1, 32>}, {pipeline_mode = #tpu.pipeline_mode<synchronous>, transform_indices = @transform_13, window_bounds = array<i64: 1, 32>}, {pipeline_mode = #tpu.pipeline_mode<synchronous>, transform_indices = @transform_14, window_bounds = array<i64: 1, 32>}, {pipeline_mode = #tpu.pipeline_mode<synchronous>, transform_indices = @transform_15, window_bounds = array<i64: 1, 32>}, {transform_indices = @transform_16, window_bounds = array<i64: 1, 8, 32>}]} {
    %c0_i32 = arith.constant 0 : i32
    %0 = arith.cmpi eq, %arg2, %c0_i32 : i32
    %1 = arith.extui %0 : i1 to i32
    %c0_i32_0 = arith.constant 0 : i32
    %2 = arith.cmpi ne, %1, %c0_i32_0 : i32
    scf.if %2 {
      %c0_34 = arith.constant 0 : index
      %c0_35 = arith.constant 0 : index
      %c0_36 = arith.constant 0 : index
      %47 = vector.load %arg3[%c0_34, %c0_35, %c0_36] : memref<1x8x32xf32, #tpu.memory_space<vmem>>, vector<1x8x32xf32>
      %48 = vector.shape_cast %47 : vector<1x8x32xf32> to vector<8x32xf32>
      %49 = arith.truncf %48 : vector<8x32xf32> to vector<8x32xbf16>
      %c0_37 = arith.constant 0 : index
      %c0_38 = arith.constant 0 : index
      %50 = vector.load %arg5[%c0_37, %c0_38] : memref<32x32xbf16, #tpu.memory_space<vmem>>, vector<32x32xbf16>
      %cst_39 = arith.constant dense<0.000000e+00> : vector<8x32xf32>
      %51 = tpu.matmul %49, %50, %cst_39 {dimension_numbers = #tpu.dot_dimension_numbers<[1], [0], [0], [1], [0, 0, 1, 1], [], []>} : vector<8x32xbf16>, vector<32x32xbf16>, vector<8x32xf32> -> vector<8x32xf32>
      %c0_40 = arith.constant 0 : index
      %c0_41 = arith.constant 0 : index
      %52 = vector.load %arg6[%c0_40, %c0_41] : memref<1x32xf32, #tpu.memory_space<vmem>>, vector<1x32xf32>
      %53 = vector.broadcast %52 : vector<1x32xf32> to vector<8x32xf32>
      %54 = arith.addf %51, %53 : vector<8x32xf32>
      %55 = vector.shape_cast %54 : vector<8x32xf32> to vector<8x4x8xf32>
      %56 = tpu.transpose %55, [1, 0, 2] : vector<8x4x8xf32> -> vector<4x8x8xf32>
      %57 = arith.truncf %56 : vector<4x8x8xf32> to vector<4x8x8xbf16>
      %c0_42 = arith.constant 0 : index
      %c0_43 = arith.constant 0 : index
      %c0_44 = arith.constant 0 : index
      %58 = vector.load %arg20[%c0_42, %c0_43, %c0_44] : memref<4x8x8xbf16, #tpu.memory_space<vmem>>, vector<4x8x8xbf16>
      tpu.vector_store %arg20[%c0_42, %c0_43, %c0_44], %57 {strides = array<i32>} : memref<4x8x8xbf16, #tpu.memory_space<vmem>>, vector<4x8x8xbf16>,
      %cst_45 = arith.constant 0xFF800000 : f32
      %59 = vector.broadcast %cst_45 : f32 to vector<4x8x1xf32>
      %c0_46 = arith.constant 0 : index
      %c0_47 = arith.constant 0 : index
      %c0_48 = arith.constant 0 : index
      %60 = vector.load %arg21[%c0_46, %c0_47, %c0_48] : memref<4x8x1xf32, #tpu.memory_space<vmem>>, vector<4x8x1xf32>
      tpu.vector_store %arg21[%c0_46, %c0_47, %c0_48], %59 {strides = array<i32>} : memref<4x8x1xf32, #tpu.memory_space<vmem>>, vector<4x8x1xf32>,
      %cst_49 = arith.constant 0.000000e+00 : f32
      %61 = vector.broadcast %cst_49 : f32 to vector<4x8x1xf32>
      %c0_50 = arith.constant 0 : index
      %c0_51 = arith.constant 0 : index
      %c0_52 = arith.constant 0 : index
      %62 = vector.load %arg22[%c0_50, %c0_51, %c0_52] : memref<4x8x1xf32, #tpu.memory_space<vmem>>, vector<4x8x1xf32>
      tpu.vector_store %arg22[%c0_50, %c0_51, %c0_52], %61 {strides = array<i32>} : memref<4x8x1xf32, #tpu.memory_space<vmem>>, vector<4x8x1xf32>,
      %cst_53 = arith.constant 0.000000e+00 : f32
      %63 = vector.broadcast %cst_53 : f32 to vector<4x8x8xf32>
      %c0_54 = arith.constant 0 : index
      %c0_55 = arith.constant 0 : index
      %c0_56 = arith.constant 0 : index
      %64 = vector.load %arg23[%c0_54, %c0_55, %c0_56] : memref<4x8x8xf32, #tpu.memory_space<vmem>>, vector<4x8x8xf32>
      tpu.vector_store %arg23[%c0_54, %c0_55, %c0_56], %63 {strides = array<i32>} : memref<4x8x8xf32, #tpu.memory_space<vmem>>, vector<4x8x8xf32>,
    } else {
    }
    %c0 = arith.constant 0 : index
    %c0_1 = arith.constant 0 : index
    %c0_2 = arith.constant 0 : index
    %3 = vector.load %arg4[%c0, %c0_1, %c0_2] : memref<1x8x32xf32, #tpu.memory_space<vmem>>, vector<1x8x32xf32>
    %4 = vector.shape_cast %3 : vector<1x8x32xf32> to vector<8x32xf32>
    %5 = arith.truncf %4 : vector<8x32xf32> to vector<8x32xbf16>
    %c0_3 = arith.constant 0 : index
    %c0_4 = arith.constant 0 : index
    %6 = vector.load %arg7[%c0_3, %c0_4] : memref<32x64xbf16, #tpu.memory_space<vmem>>, vector<32x64xbf16>
    %cst = arith.constant dense<0.000000e+00> : vector<8x64xf32>
    %7 = tpu.matmul %5, %6, %cst {dimension_numbers = #tpu.dot_dimension_numbers<[1], [0], [0], [1], [0, 0, 1, 1], [], []>} : vector<8x32xbf16>, vector<32x64xbf16>, vector<8x64xf32> -> vector<8x64xf32>
    %c0_5 = arith.constant 0 : index
    %c0_6 = arith.constant 0 : index
    %8 = vector.load %arg8[%c0_5, %c0_6] : memref<1x64xf32, #tpu.memory_space<vmem>>, vector<1x64xf32>
    %9 = vector.broadcast %8 : vector<1x64xf32> to vector<8x64xf32>
    %10 = arith.addf %7, %9 : vector<8x64xf32>
    %11 = vector.extract_strided_slice %10 {offsets = [0, 0], sizes = [8, 32], strides = [1, 1]} : vector<8x64xf32> to vector<8x32xf32>
    %12 = vector.shape_cast %11 : vector<8x32xf32> to vector<8x4x8xf32>
    %13 = tpu.transpose %12, [1, 0, 2] : vector<8x4x8xf32> -> vector<4x8x8xf32>
    %14 = arith.truncf %13 : vector<4x8x8xf32> to vector<4x8x8xbf16>
    %15 = vector.extract_strided_slice %10 {offsets = [0, 32], sizes = [8, 32], strides = [1, 1]} : vector<8x64xf32> to vector<8x32xf32>
    %16 = vector.shape_cast %15 : vector<8x32xf32> to vector<8x4x8xf32>
    %17 = tpu.transpose %16, [1, 0, 2] : vector<8x4x8xf32> -> vector<4x8x8xf32>
    %18 = arith.truncf %17 : vector<4x8x8xf32> to vector<4x8x8xbf16>
    %c0_7 = arith.constant 0 : index
    %c0_8 = arith.constant 0 : index
    %c0_9 = arith.constant 0 : index
    %19 = vector.load %arg20[%c0_7, %c0_8, %c0_9] : memref<4x8x8xbf16, #tpu.memory_space<vmem>>, vector<4x8x8xbf16>
    "tpu.trace_start"() <{level = 10 : i32, message = "hqe,hke->hqk"}> : () -> ()
    %cst_10 = arith.constant dense<0.000000e+00> : vector<4x8x8xf32>
    %20 = tpu.matmul %19, %14, %cst_10 {dimension_numbers = #tpu.dot_dimension_numbers<[2], [2], [1], [1], [0, 0, 0, 1, 1, 1], [0], [0]>} : vector<4x8x8xbf16>, vector<4x8x8xbf16>, vector<4x8x8xf32> -> vector<4x8x8xf32>
    "tpu.trace_stop"() : () -> ()
    %c0_11 = arith.constant 0 : index
    %c0_12 = arith.constant 0 : index
    %c0_13 = arith.constant 0 : index
    %21 = vector.load %arg21[%c0_11, %c0_12, %c0_13] : memref<4x8x1xf32, #tpu.memory_space<vmem>>, vector<4x8x1xf32>
    %cst_14 = arith.constant dense<0xFF800000> : vector<4x8xf32>
    %22 = vector.multi_reduction <maximumf>, %20, %cst_14 [2] : vector<4x8x8xf32> to vector<4x8xf32>
    %23 = vector.shape_cast %22 : vector<4x8xf32> to vector<4x8x1xf32>
    %24 = arith.maximumf %21, %23 : vector<4x8x1xf32>
    %25 = arith.subf %21, %24 : vector<4x8x1xf32>
    %26 = math.exp %25 : vector<4x8x1xf32>
    %27 = vector.broadcast %24 : vector<4x8x1xf32> to vector<4x8x8xf32>
    %28 = arith.subf %20, %27 : vector<4x8x8xf32>
    %29 = math.exp %28 : vector<4x8x8xf32>
    %c0_15 = arith.constant 0 : index
    %c0_16 = arith.constant 0 : index
    %c0_17 = arith.constant 0 : index
    %30 = vector.load %arg22[%c0_15, %c0_16, %c0_17] : memref<4x8x1xf32, #tpu.memory_space<vmem>>, vector<4x8x1xf32>
    %31 = arith.mulf %26, %30 : vector<4x8x1xf32>
    %cst_18 = arith.constant dense<0.000000e+00> : vector<4x8xf32>
    %32 = vector.multi_reduction <add>, %29, %cst_18 [2] : vector<4x8x8xf32> to vector<4x8xf32>
    %33 = vector.shape_cast %32 : vector<4x8xf32> to vector<4x8x1xf32>
    %34 = arith.addf %31, %33 : vector<4x8x1xf32>
    %c0_19 = arith.constant 0 : index
    %c0_20 = arith.constant 0 : index
    %c0_21 = arith.constant 0 : index
    %35 = vector.load %arg22[%c0_19, %c0_20, %c0_21] : memref<4x8x1xf32, #tpu.memory_space<vmem>>, vector<4x8x1xf32>
    tpu.vector_store %arg22[%c0_19, %c0_20, %c0_21], %34 {strides = array<i32>} : memref<4x8x1xf32, #tpu.memory_space<vmem>>, vector<4x8x1xf32>,
    %c0_22 = arith.constant 0 : index
    %c0_23 = arith.constant 0 : index
    %c0_24 = arith.constant 0 : index
    %36 = vector.load %arg23[%c0_22, %c0_23, %c0_24] : memref<4x8x8xf32, #tpu.memory_space<vmem>>, vector<4x8x8xf32>
    %37 = vector.broadcast %26 : vector<4x8x1xf32> to vector<4x8x8xf32>
    %38 = arith.mulf %37, %36 : vector<4x8x8xf32>
    %39 = arith.truncf %29 : vector<4x8x8xf32> to vector<4x8x8xbf16>
    "tpu.trace_start"() <{level = 10 : i32, message = "hqk,hke->hqe"}> : () -> ()
    %cst_25 = arith.constant dense<0.000000e+00> : vector<4x8x8xf32>
    %40 = tpu.matmul %39, %18, %cst_25 {dimension_numbers = #tpu.dot_dimension_numbers<[2], [1], [1], [2], [0, 0, 0, 1, 1, 2], [0], [0]>} : vector<4x8x8xbf16>, vector<4x8x8xbf16>, vector<4x8x8xf32> -> vector<4x8x8xf32>
    "tpu.trace_stop"() : () -> ()
    %41 = arith.addf %38, %40 : vector<4x8x8xf32>
    %c0_26 = arith.constant 0 : index
    %c0_27 = arith.constant 0 : index
    %c0_28 = arith.constant 0 : index
    %42 = vector.load %arg23[%c0_26, %c0_27, %c0_28] : memref<4x8x8xf32, #tpu.memory_space<vmem>>, vector<4x8x8xf32>
    tpu.vector_store %arg23[%c0_26, %c0_27, %c0_28], %41 {strides = array<i32>} : memref<4x8x8xf32, #tpu.memory_space<vmem>>, vector<4x8x8xf32>,
    %c0_29 = arith.constant 0 : index
    %c0_30 = arith.constant 0 : index
    %c0_31 = arith.constant 0 : index
    %43 = vector.load %arg21[%c0_29, %c0_30, %c0_31] : memref<4x8x1xf32, #tpu.memory_space<vmem>>, vector<4x8x1xf32>
    tpu.vector_store %arg21[%c0_29, %c0_30, %c0_31], %24 {strides = array<i32>} : memref<4x8x1xf32, #tpu.memory_space<vmem>>, vector<4x8x1xf32>,
    %c0_i32_32 = arith.constant 0 : i32
    %44 = arith.cmpi eq, %arg2, %c0_i32_32 : i32
    %45 = arith.extui %44 : i1 to i32
    %c0_i32_33 = arith.constant 0 : i32
    %46 = arith.cmpi ne, %45, %c0_i32_33 : i32
    scf.if %46 {
      %c0_34 = arith.constant 0 : index
      %c0_35 = arith.constant 0 : index
      %c0_36 = arith.constant 0 : index
      %47 = vector.load %arg22[%c0_34, %c0_35, %c0_36] : memref<4x8x1xf32, #tpu.memory_space<vmem>>, vector<4x8x1xf32>
      %48 = tpu.reciprocal %47 {approx = true} : vector<4x8x1xf32> -> vector<4x8x1xf32>
      %c0_37 = arith.constant 0 : index
      %c0_38 = arith.constant 0 : index
      %c0_39 = arith.constant 0 : index
      %49 = vector.load %arg23[%c0_37, %c0_38, %c0_39] : memref<4x8x8xf32, #tpu.memory_space<vmem>>, vector<4x8x8xf32>
      %50 = vector.broadcast %48 : vector<4x8x1xf32> to vector<4x8x8xf32>
      %51 = arith.mulf %49, %50 : vector<4x8x8xf32>
      %52 = tpu.transpose %51, [1, 0, 2] : vector<4x8x8xf32> -> vector<8x4x8xf32>
      %53 = vector.shape_cast %52 : vector<8x4x8xf32> to vector<8x32xf32>
      %54 = arith.truncf %53 : vector<8x32xf32> to vector<8x32xbf16>
      %c0_40 = arith.constant 0 : index
      %c0_41 = arith.constant 0 : index
      %55 = vector.load %arg9[%c0_40, %c0_41] : memref<32x32xbf16, #tpu.memory_space<vmem>>, vector<32x32xbf16>
      %cst_42 = arith.constant dense<0.000000e+00> : vector<8x32xf32>
      %56 = tpu.matmul %54, %55, %cst_42 {dimension_numbers = #tpu.dot_dimension_numbers<[1], [0], [0], [1], [0, 0, 1, 1], [], []>} : vector<8x32xbf16>, vector<32x32xbf16>, vector<8x32xf32> -> vector<8x32xf32>
      %c0_43 = arith.constant 0 : index
      %c0_44 = arith.constant 0 : index
      %57 = vector.load %arg10[%c0_43, %c0_44] : memref<1x32xf32, #tpu.memory_space<vmem>>, vector<1x32xf32>
      %58 = vector.broadcast %57 : vector<1x32xf32> to vector<8x32xf32>
      %59 = arith.addf %56, %58 : vector<8x32xf32>
      %c0_45 = arith.constant 0 : index
      %c0_46 = arith.constant 0 : index
      %c0_47 = arith.constant 0 : index
      %60 = vector.load %arg3[%c0_45, %c0_46, %c0_47] : memref<1x8x32xf32, #tpu.memory_space<vmem>>, vector<1x8x32xf32>
      %61 = vector.shape_cast %60 : vector<1x8x32xf32> to vector<8x32xf32>
      %62 = arith.addf %61, %59 : vector<8x32xf32>
      %c0_48 = arith.constant 0 : index
      %c0_49 = arith.constant 0 : index
      %63 = vector.load %arg15[%c0_48, %c0_49] : memref<1x32xf32, #tpu.memory_space<vmem>>, vector<1x32xf32>
      %c0_50 = arith.constant 0 : index
      %c0_51 = arith.constant 0 : index
      %64 = vector.load %arg16[%c0_50, %c0_51] : memref<1x32xf32, #tpu.memory_space<vmem>>, vector<1x32xf32>
      %cst_52 = arith.constant dense<0.000000e+00> : vector<8xf32>
      %65 = vector.multi_reduction <add>, %62, %cst_52 [1] : vector<8x32xf32> to vector<8xf32>
      %66 = vector.shape_cast %65 : vector<8xf32> to vector<8x1xf32>
      %cst_53 = arith.constant 3.200000e+01 : f32
      %67 = vector.broadcast %cst_53 : f32 to vector<8x1xf32>
      %68 = arith.divf %66, %67 : vector<8x1xf32>
      %69 = arith.mulf %62, %62 : vector<8x32xf32>
      %cst_54 = arith.constant dense<0.000000e+00> : vector<8xf32>
      %70 = vector.multi_reduction <add>, %69, %cst_54 [1] : vector<8x32xf32> to vector<8xf32>
      %71 = vector.shape_cast %70 : vector<8xf32> to vector<8x1xf32>
      %cst_55 = arith.constant 3.200000e+01 : f32
      %72 = vector.broadcast %cst_55 : f32 to vector<8x1xf32>
      %73 = arith.divf %71, %72 : vector<8x1xf32>
      %74 = arith.mulf %68, %68 : vector<8x1xf32>
      %75 = arith.subf %73, %74 : vector<8x1xf32>
      %cst_56 = arith.constant 0.000000e+00 : f32
      %76 = vector.broadcast %cst_56 : f32 to vector<8x1xf32>
      %77 = arith.maximumf %75, %76 : vector<8x1xf32>
      %78 = vector.broadcast %68 : vector<8x1xf32> to vector<8x32xf32>
      %79 = arith.subf %62, %78 : vector<8x32xf32>
      %cst_57 = arith.constant 9.99999974E-6 : f32
      %80 = vector.broadcast %cst_57 : f32 to vector<8x1xf32>
      %81 = arith.addf %77, %80 : vector<8x1xf32>
      %82 = math.rsqrt %81 : vector<8x1xf32>
      %83 = vector.broadcast %82 : vector<8x1xf32> to vector<8x32xf32>
      %84 = arith.mulf %79, %83 : vector<8x32xf32>
      %85 = vector.broadcast %63 : vector<1x32xf32> to vector<8x32xf32>
      %86 = arith.mulf %84, %85 : vector<8x32xf32>
      %87 = vector.broadcast %64 : vector<1x32xf32> to vector<8x32xf32>
      %88 = arith.addf %86, %87 : vector<8x32xf32>
      %89 = arith.truncf %88 : vector<8x32xf32> to vector<8x32xbf16>
      %c0_58 = arith.constant 0 : index
      %c0_59 = arith.constant 0 : index
      %90 = vector.load %arg11[%c0_58, %c0_59] : memref<32x64xbf16, #tpu.memory_space<vmem>>, vector<32x64xbf16>
      %cst_60 = arith.constant dense<0.000000e+00> : vector<8x64xf32>
      %91 = tpu.matmul %89, %90, %cst_60 {dimension_numbers = #tpu.dot_dimension_numbers<[1], [0], [0], [1], [0, 0, 1, 1], [], []>} : vector<8x32xbf16>, vector<32x64xbf16>, vector<8x64xf32> -> vector<8x64xf32>
      %c0_61 = arith.constant 0 : index
      %c0_62 = arith.constant 0 : index
      %92 = vector.load %arg12[%c0_61, %c0_62] : memref<1x64xf32, #tpu.memory_space<vmem>>, vector<1x64xf32>
      %93 = vector.broadcast %92 : vector<1x64xf32> to vector<8x64xf32>
      %94 = arith.addf %91, %93 : vector<8x64xf32>
      %cst_63 = arith.constant 0.000000e+00 : f32
      %95 = vector.broadcast %cst_63 : f32 to vector<8x64xf32>
      %96 = arith.maximumf %94, %95 : vector<8x64xf32>
      %97 = arith.truncf %96 : vector<8x64xf32> to vector<8x64xbf16>
      %c0_64 = arith.constant 0 : index
      %c0_65 = arith.constant 0 : index
      %98 = vector.load %arg13[%c0_64, %c0_65] : memref<64x32xbf16, #tpu.memory_space<vmem>>, vector<64x32xbf16>
      %cst_66 = arith.constant dense<0.000000e+00> : vector<8x32xf32>
      %99 = tpu.matmul %97, %98, %cst_66 {dimension_numbers = #tpu.dot_dimension_numbers<[1], [0], [0], [1], [0, 0, 1, 1], [], []>} : vector<8x64xbf16>, vector<64x32xbf16>, vector<8x32xf32> -> vector<8x32xf32>
      %c0_67 = arith.constant 0 : index
      %c0_68 = arith.constant 0 : index
      %100 = vector.load %arg14[%c0_67, %c0_68] : memref<1x32xf32, #tpu.memory_space<vmem>>, vector<1x32xf32>
      %101 = vector.broadcast %100 : vector<1x32xf32> to vector<8x32xf32>
      %102 = arith.addf %99, %101 : vector<8x32xf32>
      %103 = arith.addf %88, %102 : vector<8x32xf32>
      %c0_69 = arith.constant 0 : index
      %c0_70 = arith.constant 0 : index
      %104 = vector.load %arg17[%c0_69, %c0_70] : memref<1x32xf32, #tpu.memory_space<vmem>>, vector<1x32xf32>
      %c0_71 = arith.constant 0 : index
      %c0_72 = arith.constant 0 : index
      %105 = vector.load %arg18[%c0_71, %c0_72] : memref<1x32xf32, #tpu.memory_space<vmem>>, vector<1x32xf32>
      %cst_73 = arith.constant dense<0.000000e+00> : vector<8xf32>
      %106 = vector.multi_reduction <add>, %103, %cst_73 [1] : vector<8x32xf32> to vector<8xf32>
      %107 = vector.shape_cast %106 : vector<8xf32> to vector<8x1xf32>
      %cst_74 = arith.constant 3.200000e+01 : f32
      %108 = vector.broadcast %cst_74 : f32 to vector<8x1xf32>
      %109 = arith.divf %107, %108 : vector<8x1xf32>
      %110 = arith.mulf %103, %103 : vector<8x32xf32>
      %cst_75 = arith.constant dense<0.000000e+00> : vector<8xf32>
      %111 = vector.multi_reduction <add>, %110, %cst_75 [1] : vector<8x32xf32> to vector<8xf32>
      %112 = vector.shape_cast %111 : vector<8xf32> to vector<8x1xf32>
      %cst_76 = arith.constant 3.200000e+01 : f32
      %113 = vector.broadcast %cst_76 : f32 to vector<8x1xf32>
      %114 = arith.divf %112, %113 : vector<8x1xf32>
      %115 = arith.mulf %109, %109 : vector<8x1xf32>
      %116 = arith.subf %114, %115 : vector<8x1xf32>
      %cst_77 = arith.constant 0.000000e+00 : f32
      %117 = vector.broadcast %cst_77 : f32 to vector<8x1xf32>
      %118 = arith.maximumf %116, %117 : vector<8x1xf32>
      %119 = vector.broadcast %109 : vector<8x1xf32> to vector<8x32xf32>
      %120 = arith.subf %103, %119 : vector<8x32xf32>
      %cst_78 = arith.constant 9.99999974E-6 : f32
      %121 = vector.broadcast %cst_78 : f32 to vector<8x1xf32>
      %122 = arith.addf %118, %121 : vector<8x1xf32>
      %123 = math.rsqrt %122 : vector<8x1xf32>
      %124 = vector.broadcast %123 : vector<8x1xf32> to vector<8x32xf32>
      %125 = arith.mulf %120, %124 : vector<8x32xf32>
      %126 = vector.broadcast %104 : vector<1x32xf32> to vector<8x32xf32>
      %127 = arith.mulf %125, %126 : vector<8x32xf32>
      %128 = vector.broadcast %105 : vector<1x32xf32> to vector<8x32xf32>
      %129 = arith.addf %127, %128 : vector<8x32xf32>
      %c0_79 = arith.constant 0 : index
      %c0_80 = arith.constant 0 : index
      %c0_81 = arith.constant 0 : index
      %130 = vector.load %arg19[%c0_79, %c0_80, %c0_81] : memref<1x8x32xf32, #tpu.memory_space<vmem>>, vector<1x8x32xf32>
      %131 = vector.shape_cast %130 : vector<1x8x32xf32> to vector<8x32xf32>
      %132 = vector.shape_cast %129 : vector<8x32xf32> to vector<1x8x32xf32>
      tpu.vector_store %arg19[%c0_79, %c0_80, %c0_81], %132 {strides = array<i32>} : memref<1x8x32xf32, #tpu.memory_space<vmem>>, vector<1x8x32xf32>,
    } else {
    }
    return
  }
  func.func @transform_0(%arg0: i32, %arg1: i32, %arg2: i32) -> (i32, i32, i32) {
    %c0_i32 = arith.constant 0 : i32
    %c0_i32_0 = arith.constant 0 : i32
    return %arg0, %arg1, %c0_i32 : i32, i32, i32
  }
  func.func @transform_1(%arg0: i32, %arg1: i32, %arg2: i32) -> (i32, i32, i32) {
    %c0_i32 = arith.constant 0 : i32
    %c0_i32_0 = arith.constant 0 : i32
    return %arg0, %arg2, %c0_i32 : i32, i32, i32
  }
  func.func @transform_2(%arg0: i32, %arg1: i32, %arg2: i32) -> (i32, i32) {
    %c0_i32 = arith.constant 0 : i32
    %c0_i32_0 = arith.constant 0 : i32
    %c0_i32_1 = arith.constant 0 : i32
    return %c0_i32, %c0_i32_0 : i32, i32
  }
  func.func @transform_3(%arg0: i32, %arg1: i32, %arg2: i32) -> (i32, i32) {
    %c0_i32 = arith.constant 0 : i32
    %c0_i32_0 = arith.constant 0 : i32
    %c0_i32_1 = arith.constant 0 : i32
    return %c0_i32, %c0_i32_0 : i32, i32
  }
  func.func @transform_4(%arg0: i32, %arg1: i32, %arg2: i32) -> (i32, i32) {
    %c0_i32 = arith.constant 0 : i32
    %c0_i32_0 = arith.constant 0 : i32
    %c0_i32_1 = arith.constant 0 : i32
    return %c0_i32, %c0_i32_0 : i32, i32
  }
  func.func @transform_5(%arg0: i32, %arg1: i32, %arg2: i32) -> (i32, i32) {
    %c0_i32 = arith.constant 0 : i32
    %c0_i32_0 = arith.constant 0 : i32
    %c0_i32_1 = arith.constant 0 : i32
    return %c0_i32, %c0_i32_0 : i32, i32
  }
  func.func @transform_6(%arg0: i32, %arg1: i32, %arg2: i32) -> (i32, i32) {
    %c0_i32 = arith.constant 0 : i32
    %c0_i32_0 = arith.constant 0 : i32
    %c0_i32_1 = arith.constant 0 : i32
    return %c0_i32, %c0_i32_0 : i32, i32
  }
  func.func @transform_7(%arg0: i32, %arg1: i32, %arg2: i32) -> (i32, i32) {
    %c0_i32 = arith.constant 0 : i32
    %c0_i32_0 = arith.constant 0 : i32
    %c0_i32_1 = arith.constant 0 : i32
    return %c0_i32, %c0_i32_0 : i32, i32
  }
  func.func @transform_8(%arg0: i32, %arg1: i32, %arg2: i32) -> (i32, i32) {
    %c0_i32 = arith.constant 0 : i32
    %c0_i32_0 = arith.constant 0 : i32
    %c0_i32_1 = arith.constant 0 : i32
    return %c0_i32, %c0_i32_0 : i32, i32
  }
  func.func @transform_9(%arg0: i32, %arg1: i32, %arg2: i32) -> (i32, i32) {
    %c0_i32 = arith.constant 0 : i32
    %c0_i32_0 = arith.constant 0 : i32
    %c0_i32_1 = arith.constant 0 : i32
    return %c0_i32, %c0_i32_0 : i32, i32
  }
  func.func @transform_10(%arg0: i32, %arg1: i32, %arg2: i32) -> (i32, i32) {
    %c0_i32 = arith.constant 0 : i32
    %c0_i32_0 = arith.constant 0 : i32
    %c0_i32_1 = arith.constant 0 : i32
    return %c0_i32, %c0_i32_0 : i32, i32
  }
  func.func @transform_11(%arg0: i32, %arg1: i32, %arg2: i32) -> (i32, i32) {
    %c0_i32 = arith.constant 0 : i32
    %c0_i32_0 = arith.constant 0 : i32
    %c0_i32_1 = arith.constant 0 : i32
    return %c0_i32, %c0_i32_0 : i32, i32
  }
  func.func @transform_12(%arg0: i32, %arg1: i32, %arg2: i32) -> (i32, i32) {
    %c0_i32 = arith.constant 0 : i32
    %c0_i32_0 = arith.constant 0 : i32
    %c0_i32_1 = arith.constant 0 : i32
    return %c0_i32, %c0_i32_0 : i32, i32
  }
  func.func @transform_13(%arg0: i32, %arg1: i32, %arg2: i32) -> (i32, i32) {
    %c0_i32 = arith.constant 0 : i32
    %c0_i32_0 = arith.constant 0 : i32
    %c0_i32_1 = arith.constant 0 : i32
    return %c0_i32, %c0_i32_0 : i32, i32
  }
  func.func @transform_14(%arg0: i32, %arg1: i32, %arg2: i32) -> (i32, i32) {
    %c0_i32 = arith.constant 0 : i32
    %c0_i32_0 = arith.constant 0 : i32
    %c0_i32_1 = arith.constant 0 : i32
    return %c0_i32, %c0_i32_0 : i32, i32
  }
  func.func @transform_15(%arg0: i32, %arg1: i32, %arg2: i32) -> (i32, i32) {
    %c0_i32 = arith.constant 0 : i32
    %c0_i32_0 = arith.constant 0 : i32
    %c0_i32_1 = arith.constant 0 : i32
    return %c0_i32, %c0_i32_0 : i32, i32
  }
  func.func @transform_16(%arg0: i32, %arg1: i32, %arg2: i32) -> (i32, i32, i32) {
    %c0_i32 = arith.constant 0 : i32
    %c0_i32_0 = arith.constant 0 : i32
    return %arg0, %arg1, %c0_i32 : i32, i32, i32
  }
}

</mosaic_0001>

<bundles_post_ra>
// kernel: tpu_custom_call.1
= control target key start
LH: loop header
LB: loop body
LE: loop exit
PB: predicated region body
PF: predicated region fallthrough
CT: control target
= control target key end

     0   :  { %s3492_s0 = inlined_call_operand.vmem [shape: f32[2,8,32], index: 0, kind: input, shape index: {}]   ;;  %s3493_s1 = inlined_call_operand.vmem [shape: f32[2,8,32], index: 1, kind: input, shape index: {}]   ;;  %s3494_s2 = inlined_call_operand.vmem [shape: bf16[32,32], index: 2, kind: input, shape index: {}]   ;;  %s3495_s3 = inlined_call_operand.vmem [shape: f32[1,32], index: 3, kind: input, shape index: {}]   ;;  %s3496_s4 = inlined_call_operand.hbm [shape: bf16[32,64], index: 4, kind: input, shape index: {}]   ;;  %s3497_s5 = inlined_call_operand.vmem [shape: f32[1,64], index: 5, kind: input, shape index: {}]   ;;  %s3498_s6 = inlined_call_operand.hbm [shape: bf16[32,32], index: 6, kind: input, shape index: {}]   ;;  %s3499_s7 = inlined_call_operand.vmem [shape: f32[1,32], index: 7, kind: input, shape index: {}]   ;;  %s3500_s8 = inlined_call_operand.hbm [shape: bf16[32,64], index: 8, kind: input, shape index: {}]   ;;  %s3501_s9 = inlined_call_operand.vmem [shape: f32[1,64], index: 9, kind: input, shape index: {}]   ;;  %s3502_s10 = inlined_call_operand.vmem [shape: bf16[64,32], index: 10, kind: input, shape index: {}]   ;;  %s3503_s11 = inlined_call_operand.vmem [shape: f32[1,32], index: 11, kind: input, shape index: {}]   ;;  %s3504_s12 = inlined_call_operand.vmem [shape: f32[1,32], index: 12, kind: input, shape index: {}]   ;;  %s3505_s13 = inlined_call_operand.vmem [shape: f32[1,32], index: 13, kind: input, shape index: {}]   ;;  %s3506_s14 = inlined_call_operand.vmem [shape: f32[1,32], index: 14, kind: input, shape index: {}]   ;;  %s3507_s15 = inlined_call_operand.vmem [shape: f32[1,32], index: 15, kind: input, shape index: {}]   ;;  %s3508_s16 = inlined_call_operand.hbm [shape: f32[2,8,32], index: 16, kind: output, shape index: {}]  }
   0x1   :  { %3524 = sst [smem:[#allocation25_spill]] %s3492_s0 }
   0x2   :  { %3525 = sst [smem:[#allocation26_spill]] %s3498_s6 }
   0x3   :  { %3526 = sst [smem:[#allocation27_spill]] %s3506_s14 }
   0x4   :  { %3527 = sst [smem:[#allocation28_spill]] %s3507_s15 }
   0x5   :  { %3528 = sst [smem:[#allocation29_spill]] %s3508_s16 }
   0x6   :  { %21 = vsyncpa [#allocation7], 0 }
   0x7   :  { %22 = vsyncpa [#allocation10], 0 }
   0x8   :  { %23 = vsyncpa [#allocation8], 0 }
   0x9   :  { %25 = vsyncpa [#allocation8 + $0x1], 0  ;;  %s2966_s21 = smov 0   ;;  %s2968_s22 = smov 0  }
   0xa   :  { %s2970_s23 = smov 0   ;;  %s2972_s24 = smov 0  }
   0xb   :  { %s2974_s25 = smov 0   ;;  %s2976_s26 = smov 0  }
   0xc LB: > { %3529 = sst [smem:[#allocation16_spill]] %s2840_s21  ;;  %s2361_s27 = sadd.s32 4294967295, %s2860_s26   ;;  %s2860_s26 = sphi %s2976_s26, %s31_s26   ;;  %s2856_s25 = sphi %s2974_s25, %s3563_s25   ;;  %s2852_s24 = sphi %s2972_s24, %s3562_s24   ;;  %s2848_s23 = sphi %s2970_s23, %s3561_s23   ;;  %s2844_s22 = sphi %s2968_s22, %s3560_s22   ;;  %s2840_s21 = sphi %s2966_s21, %s3559_s21  }
   0xd   : > { %3530 = sst [smem:[#allocation17_spill]] %s2844_s22  ;;  %s2362_s28 = sadd.s32 4294967294, %s2860_s26  }
   0xe   : > { %3531 = sst [smem:[#allocation18_spill]] %s2848_s23  ;;  %s50_s29 = sadd.s32 1, %s2856_s25 }
   0xf   : > { %3532 = sst [smem:[#allocation19_spill]] %s2856_s25  ;;  %s409_s30 = sadd.s32 1, %s2848_s23 }
  0x10   : > { %3533 = sst [smem:[#allocation20_spill]] %s2860_s26  ;;  %p52_p0 = scmp.ge.s32.totalorder %s50_s29, 2 }
  0x11   : > { %p419_p1 = scmp.ne.s32.totalorder %s2848_s23, %s2844_s22  ;;  %p420_p2 = scmp.eq.s32.totalorder %s2361_s27, 1 }
  0x12   : > { %p425_p3 = scmp.ne.s32.totalorder %s2844_s22, %s2840_s21  ;;  %s3565_s29 = smov (%p52_p0, %s50_s29), 0 }
  0x13   : > { %3534 = sst [smem:[#allocation21_spill]] %s3565_s29  ;;  %p3006_p4 = por %p420_p2, %p419_p1 }
  0x14   : > { %p426_p5 = scmp.eq.s32.totalorder %s2362_s28, 1  ;;  %s404_s17 = ssub.s32 %s2856_s25, %s3565_s29 }
  0x15   : > { %s3535_s0 = scalar_select %p3006_p4, 1, 0 }
  0x16   : > { %p2363_p6 = scmp.ge.s32.totalorder %s2860_s26, 1  ;;  %p407_p7 = scmp.eq.s32.totalorder %s404_s17, 0 }
  0x17   : > { %3536 = sst [smem:[#allocation22_spill]] %s3535_s0  ;;  %p3013_p8 = por %p426_p5, %p425_p3 }
  0x18   : > { %p433_p9 = scmp.lt.s32.totalorder %s2860_s26, 3  ;;  %p3025_p11 = scmp.eq.s32.totalorder %s2361_s27, 0 }
  0x19   : > { %s3537_s18 = scalar_select %p3013_p8, 1, 0 }
  0x1a   : > { %s3019_s19 = scalar_select %p407_p7, %s2848_s23, %s409_s30  }
  0x1b   : > { %3538 = sst [smem:[#allocation23_spill]] %s3537_s18  ;;  %p3021_p10 = pnand %p2363_p6, %p433_p9 }
  0x1c   : > { %3539 = sst [smem:[#allocation24_spill]] %s3019_s19  ;;  %s2862_s28 = smov [#allocation9]  }
  0x1d   : > { %s3540_s20 = scalar_select %p3021_p10, 1, 0 }
  0x1e   : > { %s3541_s21 = scalar_select %p3025_p11, 1, 0 }
  0x1f   : > { %p2560_p12 = pneg %p3021_p10  ;;  %s467_s17 = sshll.u32 %s2862_s28, 4  ;;  %s468_s17 = int_to_ptr.vmem [resolvable:$true] %s467_s17 }
  0x20   : > { %s2863_s30 = smov [#allocation6]   ;;  %s3543_s6 = sld [smem:[#allocation26_spill]] }
  0x21   : > { %p3033_p13 = pnand %p3025_p11, %p2560_p12  ;;  %s451_s25 = sshll.u32 %s2863_s30, 4  ;;  %s452_s25 = int_to_ptr.vmem [resolvable:$true] %s451_s25 }
  0x23   : > { %p3045_p1 = pneg %p3033_p13 }
  0x26   : > { %s2690_s27 = scalar_lea.hbm %s3543_s6, 256 }
  0x27   : > { %p2691_p0 = scmp.ne.s32.totalorder %s3543_s6, %s2690_s27  ;;  %p2697_p5 = scmp.lt.u32.totalorder %s2690_s27, %s3543_s6 }
  0x29   : > { %p2693_p2 = pnand %p3045_p1, %p2691_p0 }
  0x2b   : > { %p2694_p3 = pneg %p2693_p2 }
  0x2d   : > { %p2699_p6 = pnand %p2697_p5, %p2694_p3 }
  0x2f   : > { %2702 = shalt.err (!%p2699_p6)
}
  0x30   : > { %s2703_s23 = scalar_lea.vmem %s468_s17, 256  ;;  %p2711_p8 = scmp.lt.s32.totalorder %s468_s17, %s468_s17 }
  0x31   : > { %p2704_p7 = scmp.ne.s32.totalorder %s468_s17, %s2703_s23  ;;  %p2712_p4 = scmp.lt.s32.totalorder %s2703_s23, %s2703_s23 }
  0x33   : > { %p2706_p9 = pnand %p2704_p7, %p3045_p1  ;;  %p2713_p11 = por %p2712_p4, %p2711_p8 }
  0x35   : > { %p2707_p12 = pneg %p2706_p9 }
  0x37   : > { %p2714_p10 = pnand %p2713_p11, %p2707_p12 }
  0x39   : > { %2717 = shalt.err (!%p2714_p10)
}
  0x3a   : > { %s2864_s26 = smov 64   ;;  %s2865_s18 = smov 4  }
  0x3b   : > { %2566 = dma.hbm_to_vmem [thread:$0]  (!%p3033_p13), %s3543_s6, 256, %s468_s17, [#allocation10], %s2864_s26, %s2864_s26, %s2865_s18  }
  0x3c   : > { %s2718_s27 = scalar_lea.hbm %s3496_s4, 256 }
  0x3d   : > { %p2719_p4 = scmp.ne.s32.totalorder %s3496_s4, %s2718_s27  ;;  %p2725_p11 = scmp.lt.u32.totalorder %s2718_s27, %s3496_s4 }
  0x3f   : > { %p2721_p8 = pnand %p2719_p4, %p3045_p1 }
  0x41   : > { %p2722_p10 = pneg %p2721_p8 }
  0x43   : > { %p2727_p0 = pnand %p2725_p11, %p2722_p10 }
  0x45   : > { %2730 = shalt.err (!%p2727_p0)
}
  0x46   : > { %s2731_s15 = scalar_lea.vmem %s452_s25, 256  ;;  %p2739_p6 = scmp.lt.s32.totalorder %s452_s25, %s452_s25 }
  0x47   : > { %p2732_p2 = scmp.ne.s32.totalorder %s452_s25, %s2731_s15  ;;  %p2740_p7 = scmp.lt.s32.totalorder %s2731_s15, %s2731_s15 }
  0x49   : > { %p2734_p3 = pnand %p2732_p2, %p3045_p1  ;;  %p2741_p9 = por %p2740_p7, %p2739_p6 }
  0x4b   : > { %p2735_p5 = pneg %p2734_p3 }
  0x4d   : > { %p2742_p12 = pnand %p2741_p9, %p2735_p5 }
  0x4f   : > { %2745 = shalt.err (!%p2742_p12)
}
  0x50   : > { %2563 = dma.hbm_to_vmem [thread:$0]  (!%p3033_p13), %s3496_s4, 256, %s452_s25, [#allocation7], %s2864_s26, %s2864_s26, %s2865_s18  }
  0x51   : > { %s2866_s0 = smov [#allocation11]   ;;  %s2746_s30 = scalar_lea.hbm %s3500_s8, 256 }
  0x52   : > { %s483_s17 = sshll.u32 %s2866_s0, 4  ;;  %p2747_p4 = scmp.ne.s32.totalorder %s3500_s8, %s2746_s30  ;;  %s484_s17 = int_to_ptr.vmem [resolvable:$true] %s483_s17 }
  0x53   : > { %p2753_p11 = scmp.lt.u32.totalorder %s2746_s30, %s3500_s8 }
  0x54   : > { %p2749_p8 = pnand %p2747_p4, %p3045_p1 }
  0x56   : > { %p2750_p10 = pneg %p2749_p8 }
  0x58   : > { %p2755_p0 = pnand %p2753_p11, %p2750_p10 }
  0x5a   : > { %2758 = shalt.err (!%p2755_p0)
}
  0x5b   : > { %s2759_s25 = scalar_lea.vmem %s484_s17, 256  ;;  %p2767_p6 = scmp.lt.s32.totalorder %s484_s17, %s484_s17 }
  0x5c   : > { %p2760_p2 = scmp.ne.s32.totalorder %s484_s17, %s2759_s25  ;;  %p2768_p7 = scmp.lt.s32.totalorder %s2759_s25, %s2759_s25 }
  0x5e   : > { %p2762_p3 = pnand %p2760_p2, %p3045_p1  ;;  %p2769_p9 = por %p2768_p7, %p2767_p6 }
  0x60   : > { %p2763_p5 = pneg %p2762_p3 }
  0x62   : > { %p2770_p12 = pnand %p2769_p9, %p2763_p5 }
  0x64   : > { %2773 = shalt.err (!%p2770_p12)
}
  0x65   : > { %2569 = dma.hbm_to_vmem [thread:$0]  (!%p3033_p13), %s3500_s8, 256, %s484_s17, [#allocation10], %s2864_s26, %s2864_s26, %s2865_s18  }
  0x66   : > { %p3545_p4 = scmp.ne.s32.totalorder %s3540_s20, 0 }
  0x67   : > { %p3546_p1 = scmp.ne.s32.totalorder (!%p3545_p4), %s3541_s21, 0 }
  0x68   : > { %540 = sbr.rel (%p3545_p4) target bundleno = 2448 (0x990), region = 84 }
  0x6f   : > { %2827 = dma.done.wait (%p3546_p1), [#allocation7], 256  }
  0x70   : > { %2829 = vsyncadd (%p3546_p1), [#allocation7], 4294967040 }
  0x71   : > { %2831 = dma.done.wait (%p3546_p1), [#allocation10], 512  }
  0x72   : > { %2833 = vsyncadd (%p3546_p1), [#allocation10], 4294966784  ;;  %p607_p8 = scmp.lt.s32.totalorder %s2852_s24, 1  ;;  %v2867_v0 = vmov 0.0   ;;  %vm2868_vm0 = vmmov 0   ;;  %s3547_s26 = sld [smem:[#allocation25_spill]]  ;;  %v710_v23 = vlaneseq }
  0x73   : > { %2454 = vmatprep.subr.bf16.mxu1 %v2867_v0  ;;  %2458 = vmatprep.mubr.msk.bf16.mxu1 %vm2868_vm0, %v2867_v0  ;;  %v2649_v1 = vld [vmem:[%s3494_s2] sm:$0xff]   ;;  %v2650_v2 = vld [vmem:[%s3494_s2 + $0x8] sm:$0xff]   ;;  %vm651_vm1 = vcmask 261120   ;;  %v2651_v4 = vld [vmem:[#allocation6] sm:$0xff]   ;;  %s2869_s25 = smov 104   ;;  %s2870_s6 = smov 120  }
  0x74   : > { %s608_s29 = scalar_select %p607_p8, %s2852_s24, 1  ;;  %2470 = vmatprep.subr.bf16.mxu0 %v2867_v0  ;;  %2472 = vmatprep.mubr.msk.bf16.mxu0 %vm2868_vm0, %v2867_v0  ;;  %v2652_v7 = vld [vmem:[#allocation6 + $0x8] sm:$0xff]   ;;  %v2375_v9 = vld [vmem:[%s3495_s3] ss:$0 sm:$0xff]  ;;  %vm859_vm2 = vcmask 64512   ;;  %v711_v27 = vshrl.u32 %v710_v23, 7 }
  0x75   : > { %2455 = vmatpush3.bf16.msra.mxu1 %v2649_v1  ;;  %v2381_v15 = vld [vmem:[%s3497_s5] ss:$0 sm:$0xff]  ;;  %860 = vst.msk [vmem:[#allocation5] sm:$0xff] %vm859_vm2, %v2867_v0  ;;  %861 = vst.msk [vmem:[#allocation5 + $0x8] sm:$0xff] %vm859_vm2, %v2867_v0  ;;  %v2872_v21 = vmov 1983009808  }
  0x76   : > { %s2373_s20 = sshll.u32 %s608_s29, 3  ;;  %2456 = vmatprep.subr.bf16.mxu1 %v2867_v0  ;;  %862 = vst.msk [vmem:[#allocation5 + $0x10] sm:$0xff] %vm859_vm2, %v2867_v0  ;;  %863 = vst.msk [vmem:[#allocation5 + $0x18] sm:$0xff] %vm859_vm2, %v2867_v0  ;;  %v708_v22 = vunpack.c.l.s4 %v2872_v21  ;;  %v2873_v24 = vmov 1934713408   ;;  %vm845_vm3 = vcmask 60416  }
  0x77   : > { %s620_s27 = scalar_lea.vmem %s3493_s1, %s2373_s20  ;;  %v740_v25 = vunpack.c.l.s4 %v2873_v24  ;;  %vm850_vm4 = vcmask 7168   ;;  %s2876_s28 = smov 96   ;;  %vm1552_vm5 = vcmask 1043456   ;;  %vm1934_vm6 = vcmask 130048  }
  0x78   : > { %s3127_s18 = scalar_lea.vmem %s3547_s26, %s2373_s20  ;;  %v864_v6 = vld [vmem:[%s620_s27] sm:$0xff]  ;;  %s2871_s20 = smov 112   ;;  %v709_v26 = vunpack.c.0.s8 %v708_v22  ;;  %855 = vst.msk [vmem:[#allocation4] sm:$0xff] %vm850_vm4, %v2867_v0  ;;  %856 = vst.msk [vmem:[#allocation4 + $0x8] sm:$0xff] %vm850_vm4, %v2867_v0  ;;  %vm1936_vm7 = vcmask 195584   ;;  %vm2148_vm8 = vcmask 523264  }
  0x79   : > { %v626_v3 = vld [vmem:[%s3127_s18] sm:$0xff]  ;;  %2457 = vmatpush3.bf16.msra.mxu1 %v2650_v2  ;;  %v865_v8 = vpack.c.bf16 %v864_v6, %v864_v6  ;;  %v741_v30 = vunpack.c.0.s8 %v740_v25  ;;  %857 = vst.msk [vmem:[#allocation4 + $0x10] sm:$0xff] %vm850_vm4, %v2867_v0  ;;  %858 = vst.msk [vmem:[#allocation4 + $0x18] sm:$0xff] %vm850_vm4, %v2867_v0  ;;  %s2877_s21 = smov 16   ;;  %s2878_s26 = smov 8  }
  0x7a   : > { %v627_v5 = vpack.c.bf16 %v626_v3, %v626_v3  ;;  %2462 = vmatprep.subr.bf16.mxu1 %v2867_v0  ;;  %v3168_v31 = vsub.s32 %v709_v26, %v711_v27  ;;  %s2879_s22 = smov 24   ;;  %s3548_s0 = sld [smem:[#allocation17_spill]] }
  0x7b   : > { %v3170_v37 = vsub.s32 %v741_v30, %v711_v27  ;;  %s3549_s19 = sld [smem:[#allocation22_spill]]  ;;  %s3550_s27 = sld [smem:[#allocation27_spill]] }
  0x7c   : > { %2459 = vmatmul.mubr.msk.bf16.vlgmr.msra.gmra.mrb[0].mxu1 %vm651_vm1, %v627_v5 }
  0x7d   : > { %2463 = vmatpush3.bf16.msra.mxu1 %v2651_v4  ;;  %2466 = vmatprep.mubr.msk.bf16.mxu1 %vm2868_vm0, %v2867_v0 }
  0x7e   : > { %2464 = vmatprep.subr.bf16.mxu1 %v2867_v0 }
  0x80   : > { %s604_s17 = sand.u32 1, %s3548_s0  }
  0x81   : > { %2465 = vmatpush3.bf16.msra.mxu1 %v2652_v7  ;;  %s2372_s16 = sshll.u32 %s604_s17, 3  ;;  %p3554_p10 = scmp.ne.s32.totalorder %s3549_s19, 0 }
  0x82   : > { %2476 = vmatprep.subr.bf16.mxu1 %v2867_v0  ;;  %s606_s14 = scalar_lea.vmem [#allocation12], %s2372_s16 }
  0x83   : > { %s2241_s29 = sshll.u32 %s606_s14, 4  ;;  %s3446_s29 = int_to_ptr.vmem [resolvable:$true] %s2241_s29 }
  0x84   : > { %2467 = vmatmul.mubr.msk.bf16.vlgmr.msra.gmra.mrb[4].mxu1 %vm651_vm1, %v865_v8 }
  0x85   : > { %2478 = vmatprep.mubr.msk.bf16.mxu1 %vm2868_vm0, %v2867_v0 }
 0x14f   : > { %v689_v10 = vpop.f32.mrb[0].mxu1 }
 0x150   : > { %v690_v11 = vadd.f32 %v2375_v9, %v689_v10  ;;  %v2460_v12 = vpop.f32.mrb[1].mxu1 }
 0x151   : > { %v692_v13 = vpop.f32.mrb[2].mxu1 }
 0x152   : > { %702 = vrot.lane.b32.xlu1 %v690_v11, %s2869_s25  ;;  %696 = vrot.lane.b32.xlu0 %v690_v11, %s2870_s6  ;;  %v2461_v14 = vpop.f32.mrb[3].mxu1 }
 0x156   : > { %699 = vrot.lane.b32.xlu0 %v690_v11, %s2871_s20 }
 0x157   : > { %v927_v16 = vpop.f32.mrb[4].mxu1 }
 0x158   : > { %v3155_v17 = vadd.f32 %v2381_v15, %v927_v16  ;;  %v2468_v18 = vpop.f32.mrb[5].mxu1 }
 0x159   : > { %v930_v19 = vpop.f32.mrb[6].mxu1 }
 0x15a   : > { %937 = vrot.lane.b32.xlu0 %v3155_v17, %s2871_s20  ;;  %934 = vrot.lane.b32.xlu1 %v3155_v17, %s2870_s6  ;;  %v2469_v20 = vpop.f32.mrb[7].mxu1  ;;  %s2418_s6 = sshll.u32 %s2852_s24, 7  ;;  %s2880_s24 = smov [#allocation12]  }
 0x15b   : > { %s2778_s16 = sshll.u32 %s2880_s24, 4  ;;  %s2779_s16 = int_to_ptr.vmem [resolvable:$false] %s2778_s16 }
 0x15c   : > { %s2780_s30 = scalar_lea.vmem %s2779_s16, 256  ;;  %p2781_p2 = scmp.lt.s32.totalorder %s3446_s29, %s2779_s16 }
 0x15e   : > { %940 = vrot.lane.b32.xlu1 %v3155_v17, %s2869_s25  ;;  %s3551_s25 = sld [smem:[#allocation28_spill]] }
 0x1c4   : > { %v703_v28 = vpop.permute.xlu1 %702  ;;  %v697_v29 = vpop.permute.xlu0 %696 }
 0x1c5   : > { %v721_v32 = vcombine.low %v697_v29, %v703_v28  ;;  %v722_v33 = vcombine.high %v697_v29, %v703_v28 }
 0x1c7   : > { %v729_v38 = vrot.slane %v721_v32, %v3168_v31  ;;  %v736_v39 = vrot.slane %v722_v33, %v3168_v31 }
 0x1c8   : > { %v700_v34 = vpop.permute.xlu0 %699 }
 0x1c9   : > { %v705_v35 = vcombine.low %v690_v11, %v700_v34  ;;  %v706_v36 = vcombine.high %v690_v11, %v700_v34 }
 0x1cb   : > { %v713_v40 = vrot.slane %v705_v35, %v3168_v31  ;;  %v720_v41 = vrot.slane %v706_v36, %v3168_v31 }
 0x1cc   : > { %v3176_v42 = vpop.permute.xlu1 %934  ;;  %v3178_v47 = vpop.permute.xlu0 %937 }
 0x1cd   : > { %v737_v43 = vcombine.low %v713_v40, %v729_v38  ;;  %v738_v44 = vcombine.high %v713_v40, %v729_v38  ;;  %v753_v45 = vcombine.low %v720_v41, %v736_v39  ;;  %v754_v46 = vcombine.high %v720_v41, %v736_v39 }
 0x1ce   : > { %v943_v52 = vcombine.low %v3155_v17, %v3178_v47  ;;  %v944_v53 = vcombine.high %v3155_v17, %v3178_v47 }
 0x1cf   : > { %v745_v48 = vrot.slane %v737_v43, %v3170_v37  ;;  %v752_v49 = vrot.slane %v738_v44, %v3170_v37  ;;  %v761_v50 = vrot.slane %v753_v45, %v3170_v37  ;;  %v768_v51 = vrot.slane %v754_v46, %v3170_v37 }
 0x1d0   : > { %v3188_v54 = vpop.permute.xlu1 %940  ;;  %v951_v2 = vrot.slane %v943_v52, %v3168_v31  ;;  %v958_v3 = vrot.slane %v944_v53, %v3168_v31 }
 0x1d1   : > { %v773_v55 = vcombine.low %v745_v48, %v752_v49  ;;  %v2379_v56 = vcombine.high %v745_v48, %v752_v49  ;;  %v789_v57 = vcombine.low %v761_v50, %v768_v51  ;;  %v2380_v58 = vcombine.high %v761_v50, %v768_v51 }
 0x1d2   : > { %v959_v59 = vcombine.low %v3176_v42, %v3188_v54  ;;  %v960_v60 = vcombine.high %v3176_v42, %v3188_v54 }
 0x1d3   : > { %v780_v61 = vrot.slane %v773_v55, %v3168_v31  ;;  %v788_v62 = vrot.slane %v2379_v56, %v3168_v31  ;;  %v796_v63 = vrot.slane %v789_v57, %v3168_v31  ;;  %v804_v1 = vrot.slane %v2380_v58, %v3168_v31 }
 0x1d4   : > { %v967_v4 = vrot.slane %v959_v59, %v3168_v31  ;;  %v974_v5 = vrot.slane %v960_v60, %v3168_v31 }
 0x1d5   : > { %v805_v6 = vcombine.low %v780_v61, %v788_v62  ;;  %v806_v7 = vcombine.high %v780_v61, %v788_v62  ;;  %v821_v8 = vcombine.low %v796_v63, %v804_v1  ;;  %v822_v9 = vcombine.high %v796_v63, %v804_v1 }
 0x1d6   : > { %v975_v10 = vcombine.low %v951_v2, %v967_v4  ;;  %v976_v11 = vcombine.high %v951_v2, %v967_v4  ;;  %v991_v12 = vcombine.low %v958_v3, %v974_v5  ;;  %v992_v13 = vcombine.high %v958_v3, %v974_v5 }
 0x1d7   : > { %v813_v14 = vrot.slane %v805_v6, %v3170_v37  ;;  %v820_v15 = vrot.slane %v806_v7, %v3170_v37  ;;  %v829_v16 = vrot.slane %v821_v8, %v3170_v37  ;;  %v836_v18 = vrot.slane %v822_v9, %v3170_v37 }
 0x1d8   : > { %v983_v19 = vrot.slane %v975_v10, %v3170_v37  ;;  %v990_v20 = vrot.slane %v976_v11, %v3170_v37  ;;  %v999_v21 = vrot.slane %v991_v12, %v3170_v37  ;;  %v1006_v22 = vrot.slane %v992_v13, %v3170_v37 }
 0x1d9   : > { %v837_v23 = vcombine.low %v813_v14, %v829_v16  ;;  %v838_v24 = vcombine.high %v813_v14, %v829_v16  ;;  %v839_v25 = vcombine.low %v820_v15, %v836_v18  ;;  %v840_v26 = vcombine.high %v820_v15, %v836_v18 }
 0x1da   : > { %v1011_v27 = vcombine.low %v983_v19, %v990_v20  ;;  %v2385_v28 = vcombine.high %v983_v19, %v990_v20  ;;  %v1027_v29 = vcombine.low %v999_v21, %v1006_v22  ;;  %v2386_v30 = vcombine.high %v999_v21, %v1006_v22 }
 0x1db   : > { %v841_v32 = vpack.c.bf16 %v837_v23, %v837_v23  ;;  %v842_v33 = vpack.c.bf16 %v838_v24, %v838_v24  ;;  %v843_v34 = vpack.c.bf16 %v839_v25, %v839_v25  ;;  %v844_v35 = vpack.c.bf16 %v840_v26, %v840_v26 }
 0x1dc   : > { %v1018_v36 = vrot.slane %v1011_v27, %v3168_v31  ;;  %v1026_v38 = vrot.slane %v2385_v28, %v3168_v31  ;;  %v1034_v39 = vrot.slane %v1027_v29, %v3168_v31  ;;  %v1042_v40 = vrot.slane %v2386_v30, %v3168_v31 }
 0x1dd   : > { %846 = vst.msk [vmem:[#allocation2] sm:$0xf] %vm845_vm3, %v841_v32  ;;  %847 = vst.msk [vmem:[#allocation2 + $0x4] sm:$0xf] %vm845_vm3, %v842_v33  ;;  %v2874_v5 = vmov -inf   ;;  %v2875_v27 = vmov 0  }
 0x1de   : > { %848 = vst.msk [vmem:[#allocation2 + $0x8] sm:$0xf] %vm845_vm3, %v843_v34  ;;  %849 = vst.msk [vmem:[#allocation2 + $0xc] sm:$0xf] %vm845_vm3, %v844_v35  ;;  %v1043_v41 = vcombine.low %v1018_v36, %v1026_v38  ;;  %v1059_v43 = vcombine.low %v1034_v39, %v1042_v40  ;;  %v1044_v44 = vcombine.high %v1018_v36, %v1026_v38  ;;  %2648 = vset.pattern.permute.xlu1 %v2875_v27 }
 0x1df   : > { %v1060_v45 = vcombine.high %v1034_v39, %v1042_v40  ;;  %851 = vst.msk [vmem:[#allocation3] sm:$0xff] %vm850_vm4, %v2874_v5  ;;  %852 = vst.msk [vmem:[#allocation3 + $0x8] sm:$0xff] %vm850_vm4, %v2874_v5  ;;  %2647 = vset.pattern.permute.xlu0 %v2875_v27 }
 0x1e0   : > { %v1051_v46 = vrot.slane %v1043_v41, %v3170_v37  ;;  %v1067_v48 = vrot.slane %v1059_v43, %v3170_v37  ;;  %v1058_v51 = vrot.slane %v1044_v44, %v3170_v37  ;;  %853 = vst.msk [vmem:[#allocation3 + $0x10] sm:$0xff] %vm850_vm4, %v2874_v5  ;;  %854 = vst.msk [vmem:[#allocation3 + $0x18] sm:$0xff] %vm850_vm4, %v2874_v5 }
 0x1e1   : > { %v1074_v52 = vrot.slane %v1060_v45, %v3170_v37 }
 0x1e2   : > { %v1075_v49 = vcombine.low %v1051_v46, %v1067_v48  ;;  %v1076_v50 = vcombine.high %v1051_v46, %v1067_v48 }
 0x1e3   : > { %v1077_v58 = vcombine.low %v1058_v51, %v1074_v52  ;;  %v1078_v59 = vcombine.high %v1058_v51, %v1074_v52 }
 0x1e4   : > { %v1079_v53 = vpack.c.bf16 %v1075_v49, %v1075_v49  ;;  %v1080_v55 = vpack.c.bf16 %v1076_v50, %v1076_v50  ;;  %v1235_v62 = vld [vmem:[#allocation2] sm:$0xf]  ;;  %v1236_v63 = vld [vmem:[#allocation2 + $0x4] sm:$0xf] }
 0x1e5   : > { %v1081_v60 = vpack.c.bf16 %v1077_v58, %v1077_v58  ;;  %v1082_v61 = vpack.c.bf16 %v1078_v59, %v1078_v59  ;;  %v1237_v3 = vld [vmem:[#allocation2 + $0x8] sm:$0xf]  ;;  %v1238_v4 = vld [vmem:[#allocation2 + $0xc] sm:$0xf] }
 0x1e6   : > { %v1244_v56 = vsel %vm859_vm2, %v1079_v53, 0  ;;  %v1290_v57 = vsel %vm859_vm2, %v1080_v55, 0  ;;  %v3274_v28 = vld [vmem:[#allocation3] sm:$0xff]  ;;  %v3276_v29 = vld [vmem:[#allocation3 + $0x8] sm:$0xff] }
 0x1e7   : > { %2471 = vmatpush3.bf16.xpose.msra.mxu0 %v1244_v56  ;;  %2477 = vmatpush3.bf16.xpose.msra.mxu1 %v1290_v57  ;;  %v1336_v1 = vsel %vm859_vm2, %v1081_v60, 0  ;;  %v1382_v2 = vsel %vm859_vm2, %v1082_v61, 0  ;;  %v3299_v39 = vld [vmem:[#allocation3 + $0x18] sm:$0xff] }
 0x1e8   : > { %2482 = vmatprep.subr.bf16.mxu0 %v2867_v0  ;;  %2488 = vmatprep.subr.bf16.mxu1 %v2867_v0 }
 0x1ee   : > { %2473 = vmatmul.mubr.msk.bf16.vlgmr.msra.gmra.mrb[0].mxu0 %vm859_vm2, %v1235_v62  ;;  %2479 = vmatmul.mubr.msk.bf16.vlgmr.msra.gmra.mrb[8].mxu1 %vm859_vm2, %v1236_v63 }
 0x1ef   : > { %2483 = vmatpush3.bf16.xpose.msra.mxu0 %v1336_v1  ;;  %2489 = vmatpush3.bf16.xpose.msra.mxu1 %v1382_v2 }
 0x1f0   : > { %2484 = vmatprep.mubr.msk.bf16.mxu0 %vm2868_vm0, %v2867_v0  ;;  %2490 = vmatprep.mubr.msk.bf16.mxu1 %vm2868_vm0, %v2867_v0 }
 0x1f1   : > { %2494 = vmatprep.subr.bf16.mxu0 %v2867_v0  ;;  %2500 = vmatprep.subr.bf16.mxu1 %v2867_v0 }
 0x1f6   : > { %2485 = vmatmul.mubr.msk.bf16.vlgmr.msra.gmra.mrb[4].mxu0 %vm859_vm2, %v1237_v3  ;;  %2491 = vmatmul.mubr.msk.bf16.vlgmr.msra.gmra.mrb[12].mxu1 %vm859_vm2, %v1238_v4 }
 0x1f7   : > { %2496 = vmatprep.mubr.msk.bf16.mxu0 %vm2868_vm0, %v2867_v0  ;;  %2502 = vmatprep.mubr.msk.bf16.mxu1 %vm2868_vm0, %v2867_v0 }
 0x2c1   : > { %v3254_v6 = vpop.f32.mrb[0].mxu0  ;;  %v3256_v7 = vpop.f32.mrb[8].mxu1 }
 0x2c2   : > { %v2474_v8 = vpop.f32.mrb[1].mxu0  ;;  %v2480_v9 = vpop.f32.mrb[9].mxu1  ;;  %v1428_v10 = vsel %vm859_vm2, %v3254_v6, -inf  ;;  %v1431_v11 = vsel %vm859_vm2, %v3256_v7, -inf }
 0x2c3   : > { %1429 = vmax.xlane.f32.xlu0 %v1428_v10  ;;  %v1283_v12 = vpop.f32.mrb[2].mxu0  ;;  %1432 = vmax.xlane.f32.xlu1 %v1431_v11  ;;  %v1329_v13 = vpop.f32.mrb[10].mxu1 }
 0x2c4   : > { %v2475_v14 = vpop.f32.mrb[3].mxu0  ;;  %v2481_v15 = vpop.f32.mrb[11].mxu1 }
 0x2c9   : > { %v3262_v16 = vpop.f32.mrb[4].mxu0  ;;  %v3264_v18 = vpop.f32.mrb[12].mxu1 }
 0x2ca   : > { %v2486_v19 = vpop.f32.mrb[5].mxu0  ;;  %v2492_v20 = vpop.f32.mrb[13].mxu1  ;;  %v1434_v21 = vsel %vm859_vm2, %v3262_v16, -inf  ;;  %v1437_v26 = vsel %vm859_vm2, %v3264_v18, -inf }
 0x2cb   : > { %1435 = vmax.xlane.f32.xlu0 %v1434_v21  ;;  %v1375_v22 = vpop.f32.mrb[6].mxu0  ;;  %v1421_v23 = vpop.f32.mrb[14].mxu1 }
 0x2cc   : > { %v2487_v24 = vpop.f32.mrb[7].mxu0  ;;  %v2493_v25 = vpop.f32.mrb[15].mxu1 }
 0x2cf   : > { %1438 = vmax.xlane.f32.xlu0 %v1437_v26 }
 0x2d4   : > { %1083 = vrot.lane.b32.xlu1 %v3155_v17, %s2876_s28 }
 0x2d8   : > { %1087 = vrot.lane.b32.xlu1 %v3178_v47, %s2876_s28 }
 0x2dc   : > { %1089 = vrot.lane.b32.xlu1 %v3188_v54, %s2876_s28  ;;  %v3294_v54 = vld [vmem:[#allocation3 + $0x10] sm:$0xff] }
 0x2e5   : > { %1085 = vrot.lane.b32.xlu0 %v3176_v42, %s2876_s28 }
 0x350   : > { %v1430_v30 = vpop.xlane.xlu0 %1429  ;;  %v1433_v32 = vpop.xlane.xlu1 %1432 }
 0x351   : > { %v3279_v33 = vmax.f32 %v3274_v28, %v1430_v30  ;;  %v3282_v34 = vmax.f32 %v3276_v29, %v1433_v32 }
 0x353   : > { %v1444_v17 = vsub.f32 %v3274_v28, %v3279_v33  ;;  %1742 = vst.msk [vmem:[#allocation3] sm:$0xff] %vm850_vm4, %v3279_v33  ;;  %v1445_v42 = vsub.f32 %v3276_v29, %v3282_v34  ;;  %1743 = vst.msk [vmem:[#allocation3 + $0x8] sm:$0xff] %vm850_vm4, %v3282_v34  ;;  %1463 = vperm.xlu1 %2648, %v3282_v34   ;;  %1458 = vperm.xlu0 %2647, %v3279_v33   ;;  %v1489_v28 = vld [vmem:[#allocation4 + $0x8] sm:$0xff]  ;;  %v1488_v33 = vld [vmem:[#allocation4] sm:$0xff] }
 0x354   : > { %v1084_v47 = vpop.permute.xlu1 %1083 }
 0x358   : > { %v1436_v35 = vpop.xlane.xlu0 %1435  ;;  %v1088_v38 = vpop.permute.xlu1 %1087 }
 0x359   : > { %v3297_v36 = vmax.f32 %v3294_v54, %v1436_v35  ;;  %v1095_v44 = vcombine.low %v1084_v47, %v1088_v38  ;;  %v1096_v45 = vcombine.high %v1084_v47, %v1088_v38 }
 0x35b   : > { %v1446_v40 = vsub.f32 %v3294_v54, %v3297_v36  ;;  %1744 = vst.msk [vmem:[#allocation3 + $0x10] sm:$0xff] %vm850_vm4, %v3297_v36  ;;  %1468 = vperm.xlu1 %2648, %v3297_v36   ;;  %v1103_v52 = vrot.slane %v1095_v44, %v3168_v31  ;;  %v1110_v53 = vrot.slane %v1096_v45, %v3168_v31 }
 0x35c   : > { %v1439_v41 = vpop.xlane.xlu0 %1438  ;;  %v1090_v48 = vpop.permute.xlu1 %1089 }
 0x35d   : > { %v3307_v43 = vmax.f32 %v3299_v39, %v1439_v41 }
 0x35f   : > { %v1447_v46 = vsub.f32 %v3299_v39, %v3307_v43  ;;  %1745 = vst.msk [vmem:[#allocation3 + $0x18] sm:$0xff] %vm850_vm4, %v3307_v43  ;;  %1473 = vperm.xlu0 %2647, %v3307_v43   ;;  %v1490_v39 = vld [vmem:[#allocation4 + $0x10] sm:$0xff] }
 0x360   : > { %v1086_v49 = vpop.permute.xlu0 %1085 }
 0x361   : > { %v1111_v50 = vcombine.low %v1086_v49, %v1090_v48  ;;  %v1112_v51 = vcombine.high %v1086_v49, %v1090_v48 }
 0x363   : > { %v1119_v55 = vrot.slane %v1111_v50, %v3168_v31  ;;  %v1126_v56 = vrot.slane %v1112_v51, %v3168_v31 }
 0x365   : > { %v1127_v57 = vcombine.low %v1103_v52, %v1119_v55  ;;  %v1128_v58 = vcombine.high %v1103_v52, %v1119_v55  ;;  %v1143_v59 = vcombine.low %v1110_v53, %v1126_v56  ;;  %v1144_v60 = vcombine.high %v1110_v53, %v1126_v56 }
 0x367   : > { %v1135_v61 = vrot.slane %v1127_v57, %v3170_v37  ;;  %v1142_v62 = vrot.slane %v1128_v58, %v3170_v37  ;;  %v1151_v63 = vrot.slane %v1143_v59, %v3170_v37  ;;  %v1158_v1 = vrot.slane %v1144_v60, %v3170_v37 }
 0x369   : > { %v1163_v2 = vcombine.low %v1135_v61, %v1142_v62  ;;  %v2387_v3 = vcombine.high %v1135_v61, %v1142_v62  ;;  %v1179_v4 = vcombine.low %v1151_v63, %v1158_v1  ;;  %v2388_v5 = vcombine.high %v1151_v63, %v1158_v1 }
 0x36b   : > { %v1170_v8 = vrot.slane %v1163_v2, %v3168_v31  ;;  %v1178_v9 = vrot.slane %v2387_v3, %v3168_v31  ;;  %v1186_v10 = vrot.slane %v1179_v4, %v3168_v31  ;;  %v1194_v11 = vrot.slane %v2388_v5, %v3168_v31 }
 0x36c   : > { %v1450_v5 = vmul.f32 1.442695, %v1445_v42 }
 0x36d   : > { %v1195_v12 = vcombine.low %v1170_v8, %v1178_v9  ;;  %v1211_v13 = vcombine.low %v1186_v10, %v1194_v11  ;;  %v1196_v14 = vcombine.high %v1170_v8, %v1178_v9  ;;  %v1212_v15 = vcombine.high %v1186_v10, %v1194_v11 }
 0x36e   : > { %v1448_v8 = vmul.f32 1.442695, %v1444_v17  ;;  %v1452_v9 = vmul.f32 1.442695, %v1446_v40  ;;  %v1454_v10 = vmul.f32 1.442695, %v1447_v46 }
 0x36f   : > { %v1203_v19 = vrot.slane %v1195_v12, %v3170_v37  ;;  %v1219_v20 = vrot.slane %v1211_v13, %v3170_v37  ;;  %v1210_v21 = vrot.slane %v1196_v14, %v3170_v37  ;;  %v1226_v22 = vrot.slane %v1212_v15, %v3170_v37  ;;  %v1491_v14 = vld [vmem:[#allocation4 + $0x18] sm:$0xff] }
 0x371   : > { %v1227_v23 = vcombine.low %v1203_v19, %v1219_v20  ;;  %v1228_v24 = vcombine.high %v1203_v19, %v1219_v20  ;;  %v1229_v25 = vcombine.low %v1210_v21, %v1226_v22  ;;  %v1230_v26 = vcombine.high %v1210_v21, %v1226_v22 }
 0x373   : > { %v1231_v27 = vpack.c.bf16 %v1227_v23, %v1227_v23  ;;  %v1232_v30 = vpack.c.bf16 %v1228_v24, %v1228_v24  ;;  %v1233_v32 = vpack.c.bf16 %v1229_v25, %v1229_v25  ;;  %v1234_v47 = vpack.c.bf16 %v1230_v26, %v1230_v26 }
 0x375   : > { %v1554_v35 = vsel %vm1552_vm5, %v1231_v27, 0  ;;  %v1600_v38 = vsel %vm1552_vm5, %v1232_v30, 0  ;;  %v1646_v41 = vsel %vm1552_vm5, %v1233_v32, 0  ;;  %v1692_v44 = vsel %vm1552_vm5, %v1234_v47, 0  ;;  %v1518_v47 = vld [vmem:[#allocation5 + $0x8] sm:$0xff] }
 0x376   : > { %2495 = vmatpush3.bf16.msra.mxu0 %v1554_v35  ;;  %2501 = vmatpush3.bf16.msra.mxu1 %v1600_v38  ;;  %v1517_v38 = vld [vmem:[#allocation5] sm:$0xff] }
 0x377   : > { %2506 = vmatprep.subr.bf16.mxu0 %v2867_v0  ;;  %2512 = vmatprep.subr.bf16.mxu1 %v2867_v0 }
 0x3d2   : > { %v1464_v45 = vpop.permute.xlu1 %1463  ;;  %v1459_v48 = vpop.permute.xlu0 %1458 }
 0x3d3   : > { %v1477_v49 = vsub.f32 %v3256_v7, %v1464_v45  ;;  %v1476_v50 = vsub.f32 %v3254_v6, %v1459_v48 }
 0x3d5   : > { %v1482_v51 = vmul.f32 1.442695, %v1477_v49  ;;  %v1480_v52 = vmul.f32 1.442695, %v1476_v50 }
 0x3d7   : > { %2661 = vpow2.f32 %v1482_v51 }
 0x3d8   : > { %2663 = vpow2.f32 %v1480_v52 }
 0x3da   : > { %v1469_v53 = vpop.permute.xlu1 %1468 }
 0x3db   : > { %v1478_v55 = vsub.f32 %v3262_v16, %v1469_v53 }
 0x3dd   : > { %v1484_v56 = vmul.f32 1.442695, %v1478_v55 }
 0x3de   : > { %v1474_v57 = vpop.permute.xlu0 %1473 }
 0x3df   : > { %2665 = vpow2.f32 %v1484_v56  ;;  %v1479_v58 = vsub.f32 %v3264_v18, %v1474_v57 }
 0x3e1   : > { %v2662_v59 = vpop.eup %2661  ;;  %v1486_v60 = vmul.f32 1.442695, %v1479_v58 }
 0x3e2   : > { %v2664_v61 = vpop.eup %2663  ;;  %v1499_v62 = vsel %vm859_vm2, %v2662_v59, 0.0  ;;  %v1546_v7 = vpack.c.bf16 %v2662_v59, %v2662_v59  ;;  %v1519_v59 = vld [vmem:[#allocation5 + $0x10] sm:$0xff] }
 0x3e3   : > { %2667 = vpow2.f32 %v1486_v60  ;;  %1500 = vadd.xlane.f32.xlu0 %v1499_v62  ;;  %v1496_v6 = vsel %vm859_vm2, %v2664_v61, 0.0  ;;  %v1545_v63 = vpack.c.bf16 %v2664_v61, %v2664_v61  ;;  %v1520_v62 = vld [vmem:[#allocation5 + $0x18] sm:$0xff] }
 0x3e4   : > { %1497 = vadd.xlane.f32.xlu1 %v1496_v6  ;;  %2503 = vmatmul.mubr.msk.bf16.vlgmr.msra.gmra.mrb[16].mxu1 %vm859_vm2, %v1546_v7  ;;  %2669 = vpow2.f32 %v1450_v5 }
 0x3e5   : > { %2497 = vmatmul.mubr.msk.bf16.vlgmr.msra.gmra.mrb[8].mxu0 %vm859_vm2, %v1545_v63  ;;  %2513 = vmatpush3.bf16.msra.mxu1 %v1692_v44  ;;  %2671 = vpow2.f32 %v1448_v8 }
 0x3e6   : > { %2507 = vmatpush3.bf16.msra.mxu0 %v1646_v41  ;;  %2508 = vmatprep.mubr.msk.bf16.mxu0 %vm2868_vm0, %v2867_v0  ;;  %2673 = vpow2.f32 %v1452_v9 }
 0x3e7   : > { %2514 = vmatprep.mubr.msk.bf16.mxu1 %vm2868_vm0, %v2867_v0  ;;  %2518 = vmatprep.subr.bf16.mxu0 %v2867_v0  ;;  %2675 = vpow2.f32 %v1454_v10 }
 0x3e8   : > { %2526 = vmatprep.subr.bf16.mxu1 %v2867_v0 }
 0x3e9   : > { %v2666_v16 = vpop.eup %2665 }
 0x3ea   : > { %v1502_v18 = vsel %vm859_vm2, %v2666_v16, 0.0  ;;  %v1547_v1 = vpack.c.bf16 %v2666_v16, %v2666_v16 }
 0x3eb   : > { %1503 = vadd.xlane.f32.xlu0 %v1502_v18 }
 0x3ed   : > { %v2668_v2 = vpop.eup %2667  ;;  %2509 = vmatmul.mubr.msk.bf16.vlgmr.msra.gmra.mrb[12].mxu0 %vm859_vm2, %v1547_v1 }
 0x3ee   : > { %v1505_v3 = vsel %vm859_vm2, %v2668_v2, 0.0  ;;  %v1548_v4 = vpack.c.bf16 %v2668_v2, %v2668_v2  ;;  %2522 = vmatprep.mubr.msk.bf16.mxu0 %vm2868_vm0, %v2867_v0  ;;  %v2670_v29 = vpop.eup %2669 }
 0x3ef   : > { %1506 = vadd.xlane.f32.xlu1 %v1505_v3  ;;  %v2672_v34 = vpop.eup %2671  ;;  %v1493_v17 = vmul.f32 %v2670_v29, %v1489_v28 }
 0x3f0   : > { %2515 = vmatmul.mubr.msk.bf16.vlgmr.msra.gmra.mrb[20].mxu1 %vm859_vm2, %v1548_v4  ;;  %v2674_v42 = vpop.eup %2673  ;;  %v1492_v54 = vmul.f32 %v2672_v34, %v1488_v33 }
 0x3f1   : > { %2530 = vmatprep.mubr.msk.bf16.mxu1 %vm2868_vm0, %v2867_v0  ;;  %v2676_v11 = vpop.eup %2675  ;;  %v1494_v43 = vmul.f32 %v2674_v42, %v1490_v39 }
 0x3f2   : > { %v1495_v20 = vmul.f32 %v2676_v11, %v1491_v14 }
 0x400   : > { %1528 = vperm.xlu1 %2648, %v2670_v29  }
 0x401   : > { %1523 = vperm.xlu0 %2647, %v2672_v34  }
 0x404   : > { %1533 = vperm.xlu1 %2648, %v2674_v42  }
 0x405   : > { %1538 = vperm.xlu0 %2647, %v2676_v11  }
 0x470   : > { %v1501_v36 = vpop.xlane.xlu0 %1500 }
 0x471   : > { %v1498_v40 = vpop.xlane.xlu1 %1497  ;;  %v1509_v12 = vadd.f32 %v1501_v36, %v1493_v17 }
 0x472   : > { %v1508_v13 = vadd.f32 %v1498_v40, %v1492_v54 }
 0x473   : > { %1514 = vst.msk [vmem:[#allocation4 + $0x8] sm:$0xff] %vm850_vm4, %v1509_v12 }
 0x474   : > { %1513 = vst.msk [vmem:[#allocation4] sm:$0xff] %vm850_vm4, %v1508_v13 }
 0x478   : > { %v1504_v46 = vpop.xlane.xlu0 %1503 }
 0x479   : > { %v1510_v15 = vadd.f32 %v1504_v46, %v1494_v43 }
 0x47a   : > { %v1750_v19 = vld [vmem:[#allocation4 + $0x8] sm:$0xff] }
 0x47b   : > { %1515 = vst.msk [vmem:[#allocation4 + $0x10] sm:$0xff] %vm850_vm4, %v1510_v15  ;;  %v1749_v21 = vld [vmem:[#allocation4] sm:$0xff]  ;;  %2677 = vrcp.f32 %v1750_v19 }
 0x47c   : > { %v1507_v22 = vpop.xlane.xlu1 %1506  ;;  %2679 = vrcp.f32 %v1749_v21 }
 0x47d   : > { %v1511_v23 = vadd.f32 %v1507_v22, %v1495_v20 }
 0x47f   : > { %1516 = vst.msk [vmem:[#allocation4 + $0x18] sm:$0xff] %vm850_vm4, %v1511_v23 }
 0x480   : > { %v1529_v35 = vpop.permute.xlu1 %1528  ;;  %v1524_v41 = vpop.permute.xlu0 %1523 }
 0x481   : > { %v1542_v44 = vmul.f32 %v1529_v35, %v1518_v47  ;;  %v1541_v45 = vmul.f32 %v1524_v41, %v1517_v38 }
 0x482   : > { %v1751_v24 = vld [vmem:[#allocation4 + $0x10] sm:$0xff] }
 0x483   : > { %2681 = vrcp.f32 %v1751_v24 }
 0x484   : > { %v1534_v60 = vpop.permute.xlu1 %1533  ;;  %v1539_v7 = vpop.permute.xlu0 %1538 }
 0x485   : > { %v2678_v25 = vpop.eup %2677  ;;  %v1543_v61 = vmul.f32 %v1534_v60, %v1519_v59  ;;  %v1544_v18 = vmul.f32 %v1539_v7, %v1520_v62 }
 0x486   : > { %v2680_v26 = vpop.eup %2679  ;;  %1768 = vperm.xlu0 %2647, %v2678_v25   ;;  %v1752_v27 = vld [vmem:[#allocation4 + $0x18] sm:$0xff]  ;;  %v2653_v25 = vld [vmem:[#allocation9] sm:$0xff]  }
 0x487   : > { %1763 = vperm.xlu1 %2648, %v2680_v26   ;;  %2683 = vrcp.f32 %v1752_v27  ;;  %2519 = vmatpush3.bf16.msra.mxu0 %v2653_v25 }
 0x488   : > { %2520 = vmatprep.subr.bf16.mxu0 %v2867_v0 }
 0x48d   : > { %v2682_v30 = vpop.eup %2681 }
 0x48e   : > { %1773 = vperm.xlu1 %2648, %v2682_v30  }
 0x491   : > { %v2684_v32 = vpop.eup %2683 }
 0x492   : > { %1778 = vperm.xlu0 %2647, %v2684_v32  }
 0x4b7   : > { %v1636_v48 = vpop.f32.mrb[16].mxu1 }
 0x4b8   : > { %v1590_v49 = vpop.f32.mrb[8].mxu0  ;;  %v1735_v50 = vadd.f32 %v1636_v48, %v1542_v44  ;;  %v2504_v51 = vpop.f32.mrb[17].mxu1  ;;  %v2654_v44 = vld [vmem:[#allocation9 + $0x8] sm:$0xff]  }
 0x4b9   : > { %v1734_v52 = vadd.f32 %v1590_v49, %v1541_v45  ;;  %v2498_v53 = vpop.f32.mrb[9].mxu0  ;;  %v1639_v55 = vpop.f32.mrb[18].mxu1  ;;  %2521 = vmatpush3.bf16.msra.mxu0 %v2654_v44 }
 0x4ba   : > { %1739 = vst.msk [vmem:[#allocation5 + $0x8] sm:$0xff] %vm859_vm2, %v1735_v50  ;;  %v1593_v56 = vpop.f32.mrb[10].mxu0  ;;  %v2505_v57 = vpop.f32.mrb[19].mxu1  ;;  %2534 = vmatprep.subr.bf16.mxu0 %v2867_v0 }
 0x4bb   : > { %1738 = vst.msk [vmem:[#allocation5] sm:$0xff] %vm859_vm2, %v1734_v52  ;;  %v2499_v58 = vpop.f32.mrb[11].mxu0 }
 0x4c0   : > { %v1682_v6 = vpop.f32.mrb[12].mxu0 }
 0x4c1   : > { %v1736_v63 = vadd.f32 %v1682_v6, %v1543_v61  ;;  %v2510_v16 = vpop.f32.mrb[13].mxu0  ;;  %v1758_v17 = vld [vmem:[#allocation5 + $0x8] sm:$0xff] }
 0x4c2   : > { %v1685_v1 = vpop.f32.mrb[14].mxu0  ;;  %v1757_v28 = vld [vmem:[#allocation5] sm:$0xff] }
 0x4c3   : > { %1740 = vst.msk [vmem:[#allocation5 + $0x10] sm:$0xff] %vm859_vm2, %v1736_v63  ;;  %v2511_v2 = vpop.f32.mrb[15].mxu0  ;;  %v1728_v3 = vpop.f32.mrb[20].mxu1 }
 0x4c4   : > { %v1737_v4 = vadd.f32 %v1728_v3, %v1544_v18  ;;  %v2516_v5 = vpop.f32.mrb[21].mxu1  ;;  %v2399_v2 = vld [vmem:[%s3499_s7] ss:$0 sm:$0xff] }
 0x4c5   : > { %v1731_v8 = vpop.f32.mrb[22].mxu1 }
 0x4c6   : > { %1741 = vst.msk [vmem:[#allocation5 + $0x18] sm:$0xff] %vm859_vm2, %v1737_v4  ;;  %v2517_v9 = vpop.f32.mrb[23].mxu1 }
 0x4c7   : > { %v2689_v9 = vld [vmem:[%s3127_s18] sm:$0xff]  ;;  %s2774_s18 = scalar_lea.vmem %s3446_s29, 128 }
 0x4c8   : > { %p2775_p13 = scmp.ne.s32.totalorder %s3446_s29, %s2774_s18  ;;  %p2782_p3 = scmp.lt.s32.totalorder %s2780_s30, %s2774_s18 }
 0x4ca   : > { %v1759_v34 = vld [vmem:[#allocation5 + $0x10] sm:$0xff]  ;;  %p2776_p11 = pnand %p2775_p13, %p3554_p10  ;;  %p2783_p5 = por %p2782_p3, %p2781_p2 }
 0x4cc   : > { %p2777_p0 = pneg %p2776_p11 }
 0x4cd   : > { %v1760_v36 = vld [vmem:[#allocation5 + $0x18] sm:$0xff] }
 0x4ce   : > { %p2784_p6 = pnand %p2783_p5, %p2777_p0 }
 0x505   : > { %v1769_v29 = vpop.permute.xlu0 %1768 }
 0x506   : > { %v1764_v10 = vpop.permute.xlu1 %1763  ;;  %v1782_v40 = vmul.f32 %v1769_v29, %v1758_v17  ;;  %v2657_v17 = vld [vmem:[%s3502_s10] sm:$0xff]  }
 0x507   : > { %v1781_v33 = vmul.f32 %v1764_v10, %v1757_v28  ;;  %v2655_v28 = vld [vmem:[#allocation11] sm:$0xff]  }
 0x508   : > { %2527 = vmatpush3.bf16.msra.mxu1 %v2655_v28 }
 0x509   : > { %2528 = vmatprep.subr.bf16.mxu1 %v2867_v0 }
 0x50d   : > { %v1774_v42 = vpop.permute.xlu1 %1773 }
 0x50e   : > { %v1783_v11 = vmul.f32 %v1774_v42, %v1759_v34 }
 0x510   : > { %v1785_v12 = vcombine.low %v1781_v33, %v1783_v11  ;;  %v1786_v13 = vcombine.high %v1781_v33, %v1783_v11  ;;  %v2656_v33 = vld [vmem:[#allocation11 + $0x8] sm:$0xff]  }
 0x511   : > { %v1779_v54 = vpop.permute.xlu0 %1778  ;;  %2529 = vmatpush3.bf16.msra.mxu1 %v2656_v33 }
 0x512   : > { %v1784_v39 = vmul.f32 %v1779_v54, %v1760_v36  ;;  %v1793_v14 = vrot.slane %v1785_v12, %v3168_v31  ;;  %v1800_v15 = vrot.slane %v1786_v13, %v3168_v31  ;;  %v2658_v54 = vld [vmem:[%s3502_s10 + $0x8] sm:$0xff]  }
 0x514   : > { %v1801_v43 = vcombine.low %v1782_v40, %v1784_v39  ;;  %v1802_v46 = vcombine.high %v1782_v40, %v1784_v39 }
 0x516   : > { %v1809_v19 = vrot.slane %v1801_v43, %v3168_v31  ;;  %v1816_v20 = vrot.slane %v1802_v46, %v3168_v31 }
 0x518   : > { %v1817_v21 = vcombine.low %v1793_v14, %v1809_v19  ;;  %v1818_v22 = vcombine.high %v1793_v14, %v1809_v19  ;;  %v1833_v23 = vcombine.low %v1800_v15, %v1816_v20  ;;  %v1834_v24 = vcombine.high %v1800_v15, %v1816_v20  ;;  %v2403_v20 = vld [vmem:[%s3504_s12] ss:$0 sm:$0xff] }
 0x51a   : > { %v1825_v26 = vrot.slane %v1817_v21, %v3170_v37  ;;  %v1832_v27 = vrot.slane %v1818_v22, %v3170_v37  ;;  %v1841_v30 = vrot.slane %v1833_v23, %v3170_v37  ;;  %v1848_v32 = vrot.slane %v1834_v24, %v3170_v37  ;;  %v2404_v22 = vld [vmem:[%s3505_s13] ss:$0 sm:$0xff] }
 0x51c   : > { %v1853_v47 = vcombine.low %v1825_v26, %v1832_v27  ;;  %v2397_v35 = vcombine.high %v1825_v26, %v1832_v27  ;;  %v1869_v38 = vcombine.low %v1841_v30, %v1848_v32  ;;  %v2398_v41 = vcombine.high %v1841_v30, %v1848_v32  ;;  %v2659_v26 = vld [vmem:[%s3502_s10 + $0x10] sm:$0xff]   ;;  %v2660_v27 = vld [vmem:[%s3502_s10 + $0x18] sm:$0xff]   ;;  %v2405_v30 = vld [vmem:[%s3501_s9] ss:$0 sm:$0xff] }
 0x51e   : > { %v1860_v45 = vrot.slane %v1853_v47, %v3168_v31  ;;  %v1868_v48 = vrot.slane %v2397_v35, %v3168_v31  ;;  %v1876_v49 = vrot.slane %v1869_v38, %v3168_v31  ;;  %v1884_v50 = vrot.slane %v2398_v41, %v3168_v31 }
 0x520   : > { %v1886_v51 = vcombine.high %v1860_v45, %v1868_v48  ;;  %v1902_v52 = vcombine.high %v1876_v49, %v1884_v50  ;;  %v1885_v53 = vcombine.low %v1860_v45, %v1868_v48  ;;  %v1901_v55 = vcombine.low %v1876_v49, %v1884_v50 }
 0x522   : > { %v1900_v56 = vrot.slane %v1886_v51, %v3170_v37  ;;  %v1916_v57 = vrot.slane %v1902_v52, %v3170_v37  ;;  %v1893_v58 = vrot.slane %v1885_v53, %v3170_v37  ;;  %v1909_v59 = vrot.slane %v1901_v55, %v3170_v37 }
 0x524   : > { %v1919_v60 = vcombine.low %v1900_v56, %v1916_v57  ;;  %v1918_v61 = vcombine.high %v1893_v58, %v1909_v59  ;;  %v1917_v62 = vcombine.low %v1893_v58, %v1909_v59  ;;  %v1920_v31 = vcombine.high %v1900_v56, %v1916_v57 }
 0x526   : > { %1926 = vrot.lane.b32.xlu0 %v1919_v60, %s2877_s21  ;;  %1922 = vrot.lane.b32.xlu1 %v1918_v61, %s2878_s26  ;;  %s3552_s21 = sld [smem:[#allocation29_spill]] }
 0x52a   : > { %1930 = vrot.lane.b32.xlu1 %v1920_v31, %s2879_s22  ;;  %s2227_s22 = scalar_lea.sflag [#allocation8], %s604_s17 }
 0x52c   : > { %s3553_s0 = smov %s3552_s21  ;;  %s3444_s26 = scalar_lea.hbm %s3552_s21, %s2418_s6 }
 0x598   : > { %v1923_v7 = vpop.permute.xlu1 %1922  ;;  %v1927_v6 = vpop.permute.xlu0 %1926 }
 0x599   : > { %v1933_v63 = vsel %vm859_vm2, %v1917_v62, %v1923_v7 }
 0x59a   : > { %v1935_v18 = vsel %vm1934_vm6, %v1933_v63, %v1927_v6 }
 0x59c   : > { %v1931_v16 = vpop.permute.xlu1 %1930 }
 0x59d   : > { %v1937_v37 = vsel %vm1936_vm7, %v1935_v18, %v1931_v16  ;;  %v2415_v18 = vld [vmem:[%s3550_s27] ss:$0 sm:$0xff] }
 0x59e   : > { %v1938_v1 = vpack.c.bf16 %v1937_v37, %v1937_v37 }
 0x5a0   : > { %2523 = vmatmul.mubr.msk.bf16.vlgmr.msra.gmra.mrb[16].mxu0 %vm651_vm1, %v1938_v1  ;;  %v2416_v1 = vld [vmem:[%s3551_s25] ss:$0 sm:$0xff] }
 0x5a1   : > { %2542 = vmatprep.mubr.msk.bf16.mxu0 %vm2868_vm0, %v2867_v0  ;;  %2535 = vmatpush3.bf16.msra.mxu0 %v2657_v17 }
 0x5a2   : > { %2536 = vmatprep.subr.bf16.mxu0 %v2867_v0 }
 0x5a5   : > { %2537 = vmatpush3.bf16.msra.mxu0 %v2658_v54 }
 0x5a6   : > { %2538 = vmatprep.subr.bf16.mxu0 %v2867_v0 }
 0x5a9   : > { %2539 = vmatpush3.bf16.msra.mxu0 %v2659_v26 }
 0x5aa   : > { %2540 = vmatprep.subr.bf16.mxu0 %v2867_v0  ;;  %v2409_v0 = vld [vmem:[%s3503_s11] ss:$0 sm:$0xff] }
 0x5ad   : > { %2541 = vmatpush3.bf16.msra.mxu0 %v2660_v27 }
 0x673   : > { %v1999_v3 = vpop.f32.mrb[16].mxu0 }
 0x674   : > { %v2000_v4 = vadd.f32 %v2399_v2, %v1999_v3  ;;  %v2524_v5 = vpop.f32.mrb[17].mxu0 }
 0x675   : > { %v2002_v8 = vpop.f32.mrb[18].mxu0 }
 0x676   : > { %v2006_v10 = vadd.f32 %v2689_v9, %v2000_v4  ;;  %v2525_v29 = vpop.f32.mrb[19].mxu0 }
 0x678   : > { %v2009_v34 = vsel %vm651_vm1, %v2006_v10, 0.0  ;;  %v2014_v42 = vmul.f32 %v2006_v10, %v2006_v10 }
 0x679   : > { %2010 = vadd.xlane.f32.xlu0 %v2009_v34 }
 0x67a   : > { %v2015_v11 = vsel %vm651_vm1, %v2014_v42, 0.0 }
 0x67b   : > { %2016 = vadd.xlane.f32.xlu1 %v2015_v11 }
 0x706   : > { %v2011_v36 = vpop.xlane.xlu0 %2010 }
 0x707   : > { %v2013_v40 = vmul.f32 0.03125, %v2011_v36 }
 0x708   : > { %v2017_v12 = vpop.xlane.xlu1 %2016 }
 0x709   : > { %v2019_v13 = vmul.f32 %v2013_v40, %v2013_v40  ;;  %v2018_v39 = vmul.f32 0.03125, %v2017_v12  ;;  %v2022_v15 = vsub.f32 %v2006_v10, %v2013_v40 }
 0x70b   : > { %v2020_v43 = vsub.f32 %v2018_v39, %v2019_v13 }
 0x70d   : > { %v2021_v46 = vmax.f32 %v2020_v43, 0.0 }
 0x70f   : > { %v2023_v14 = vadd.f32 1e-05, %v2021_v46 }
 0x711   : > { %2685 = vrsqrt.f32 %v2023_v14 }
 0x71b   : > { %v2686_v19 = vpop.eup %2685 }
 0x71c   : > { %v2025_v21 = vmul.f32 %v2686_v19, %v2022_v15 }
 0x71e   : > { %v2032_v23 = vmul.f32 %v2403_v20, %v2025_v21 }
 0x720   : > { %v2039_v24 = vadd.f32 %v2404_v22, %v2032_v23 }
 0x722   : > { %v2040_v25 = vpack.c.bf16 %v2039_v24, %v2039_v24 }
 0x724   : > { %2531 = vmatmul.mubr.msk.bf16.vlgmr.msra.gmra.mrb[24].mxu1 %vm651_vm1, %v2040_v25 }
 0x7f7   : > { %v2101_v32 = vpop.f32.mrb[24].mxu1 }
 0x7f8   : > { %v2102_v47 = vadd.f32 %v2405_v30, %v2101_v32  ;;  %v2532_v35 = vpop.f32.mrb[25].mxu1 }
 0x7f9   : > { %v2104_v38 = vpop.f32.mrb[26].mxu1 }
 0x7fa   : > { %v2107_v41 = vmax.f32 %v2102_v47, 0.0  ;;  %v2533_v44 = vpop.f32.mrb[27].mxu1 }
 0x7fc   : > { %v2108_v45 = vpack.c.bf16 %v2107_v41, %v2107_v41 }
 0x7fe   : > { %2543 = vmatmul.mubr.msk.bf16.vlgmr.msra.gmra.mrb[20].mxu0 %vm2148_vm8, %v2108_v45 }
 0x8d1   : > { %v2186_v48 = vpop.f32.mrb[20].mxu0 }
 0x8d2   : > { %v2187_v49 = vadd.f32 %v2409_v0, %v2186_v48  ;;  %v2544_v50 = vpop.f32.mrb[21].mxu0 }
 0x8d3   : > { %v2189_v51 = vpop.f32.mrb[22].mxu0 }
 0x8d4   : > { %v2192_v52 = vadd.f32 %v2187_v49, %v2039_v24  ;;  %v2545_v53 = vpop.f32.mrb[23].mxu0 }
 0x8d6   : > { %v2195_v55 = vsel %vm651_vm1, %v2192_v52, 0.0  ;;  %v2199_v56 = vmul.f32 %v2192_v52, %v2192_v52 }
 0x8d7   : > { %2196 = vadd.xlane.f32.xlu0 %v2195_v55 }
 0x8d8   : > { %v2200_v57 = vsel %vm651_vm1, %v2199_v56, 0.0 }
 0x8db   : > { %2201 = vadd.xlane.f32.xlu0 %v2200_v57 }
 0x964   : > { %v2197_v58 = vpop.xlane.xlu0 %2196 }
 0x965   : > { %v2198_v59 = vmul.f32 0.03125, %v2197_v58 }
 0x967   : > { %v2204_v61 = vmul.f32 %v2198_v59, %v2198_v59  ;;  %v2207_v63 = vsub.f32 %v2192_v52, %v2198_v59 }
 0x968   : > { %v2202_v60 = vpop.xlane.xlu0 %2201 }
 0x969   : > { %v2203_v62 = vmul.f32 0.03125, %v2202_v60 }
 0x96b   : > { %v2205_v31 = vsub.f32 %v2203_v62, %v2204_v61 }
 0x96d   : > { %v2206_v7 = vmax.f32 %v2205_v31, 0.0 }
 0x96f   : > { %v2208_v6 = vadd.f32 1e-05, %v2206_v7 }
 0x971   : > { %2687 = vrsqrt.f32 %v2208_v6 }
 0x97b   : > { %v2688_v16 = vpop.eup %2687 }
 0x97c   : > { %v2210_v37 = vmul.f32 %v2688_v16, %v2207_v63 }
 0x97e   : > { %v2217_v2 = vmul.f32 %v2415_v18, %v2210_v37 }
 0x980   : > { %v2224_v3 = vadd.f32 %v2416_v1, %v2217_v2 }
 0x982   : > { %2225 = vst.msk [vmem:[%s606_s14] sm:$0xff] %vm651_vm1, %v2224_v3 }
 0x983   : > { %2787 = shalt.err (!%p2784_p6)
}
 0x984   : > { %s2788_s17 = scalar_lea.hbm %s3444_s26, 128  ;;  %s2792_s15 = scalar_lea.hbm %s3553_s0, 256 }
 0x985   : > { %p2789_p7 = scmp.ne.s32.totalorder %s3444_s26, %s2788_s17  ;;  %p2793_p4 = scmp.lt.u32.totalorder %s3444_s26, %s3553_s0 }
 0x986   : > { %p2794_p1 = scmp.lt.u32.totalorder %s2792_s15, %s2788_s17  ;;  %p2796_p13 = scmp.lt.u32.totalorder %s2788_s17, %s3444_s26 }
 0x987   : > { %p2790_p9 = pnand %p2789_p7, %p3554_p10 }
 0x988   : > { %p2795_p8 = por %p2794_p1, %p2793_p4 }
 0x989   : > { %p2791_p12 = pneg %p2790_p9 }
 0x98a   : > { %p2797_p11 = por %p2796_p13, %p2795_p8 }
 0x98c   : > { %p2798_p0 = pnand %p2797_p11, %p2791_p12 }
 0x98e   : > { %2801 = shalt.err (!%p2798_p0)
}
 0x98f   : > { %2558 = dma.vmem_to_hbm [thread:$0]  (%p3554_p10), %s3446_s29, 128, %s3444_s26, %s2227_s22  }
 0x990 PF: > { %s3555_s14 = sld [smem:[#allocation20_spill]]  ;;  %s3556_s20 = sld [smem:[#allocation16_spill]] }
 0x991   : > { %s3557_s28 = sld [smem:[#allocation23_spill]] }
 0x996   : > { %p2580_p2 = scmp.ge.s32.totalorder %s3555_s14, 2  ;;  %s2253_s21 = sand.u32 1, %s3556_s20  }
 0x997   : > { %p3558_p3 = scmp.ne.s32.totalorder %s3557_s28, 0  ;;  %s2254_s18 = scalar_lea.sflag [#allocation8], %s2253_s21 }
 0x999   : > { %p2571_p5 = pnand %p2580_p2, %p3558_p3 }
 0x99b   : > { %2835 = dma.done.wait (!%p2571_p5), %s2254_s18, 128  }
 0x99c   : > { %2837 = vsyncadd (!%p2571_p5), %s2254_s18, 4294967168  ;;  %s31_s26 = sadd.s32 1, %s3555_s14   ;;  %s3559_s21 = sld [smem:[#allocation17_spill]] }
 0x99d   : > { %p28_p6 = scmp.ge.s32.totalorder %s31_s26, 4   ;;  %s3560_s22 = sld [smem:[#allocation18_spill]] }
 0x99e   : > { %s3561_s23 = sld [smem:[#allocation24_spill]]  ;;  %s3562_s24 = sld [smem:[#allocation19_spill]] }
 0x99f   : > { %s3563_s25 = sld [smem:[#allocation21_spill]]  ;;  %30 = sbr.rel (!%p28_p6) target bundleno = 12 (0xc), region = 143 }
 0x9a6   :  { %2259 = vsyncpa [#allocation7], 1 }
 0x9a7   :  { %2261 = vsyncpa [#allocation7 + $0x1], 1 }
 0x9a8   :  { %2262 = vsyncpa [#allocation10], 1 }
 0x9a9   :  { %2263 = vsyncpa [#allocation8], 1 }
 0x9aa   :  { %2265 = vsyncpa [#allocation8 + $0x1], 1 }

</bundles_post_ra>
